<compile_context>
chip_gen: v6e
topology: v6e:2x2x1
jax: 0.10.0
libtpu: 0.0.40
codegen_flags: <defaults>
</compile_context>

<pallas_src>
import jax
import jax.numpy as jnp
from jax.experimental import pallas as pl
from jax.experimental.pallas import tpu as pltpu

# ----------------------------------------------------------------------------- config
PATCH = 16
IMG = 32
IN_CHANS = 3
EMBED_DIM = 64
DEPTH = 2
NUM_HEADS = 4
HEAD_DIM = EMBED_DIM // NUM_HEADS
MLP_HIDDEN = 4 * EMBED_DIM
NUM_CLASSES = 10
NUM_PATCHES = (IMG // PATCH) ** 2
SEQ = NUM_PATCHES + 1            # +1 cls token (= 5 here)
SEQ_PAD = 8                      # padded to one 8-sublane tile; pad KEYS masked in softmax
PPC = PATCH * PATCH * IN_CHANS   # flattened patch length
HEAD_PAD = 128                   # lane-dense head output; sliced to NUM_CLASSES in wrapper
LN_EPS = 1e-6


# ----------------------------------------------------------------------------- fused kernel
def _vit_kernel(patches_ref, patch_w_ref, poscls_ref,
                ln1_g_ref, ln1_b_ref, qkv_w_ref, qkv_b_ref,
                proj_w_ref, proj_b_ref, ln2_g_ref, ln2_b_ref,
                fc1_w_ref, fc1_b_ref, fc2_w_ref, fc2_b_ref,
                norm_g_ref, norm_b_ref, head_w_ref, head_b_ref,
                out_ref):
    """Whole ViT forward for ONE image (grid axis = batch); everything VMEM-resident."""
    f32, bf16 = jnp.float32, jnp.bfloat16

    def matmul(x, w, b=None):
        # bf16 operands (MXU-native on all generations), f32 accumulate.
        r = jnp.dot(x.astype(bf16), w.astype(bf16), preferred_element_type=f32)
        return r if b is None else r + b.astype(f32)

    def layernorm(x, g, b):
        mean = jnp.mean(x, axis=-1, keepdims=True)
        xc = x - mean
        var = jnp.mean(xc * xc, axis=-1, keepdims=True)
        return xc * jax.lax.rsqrt(var + LN_EPS) * g.astype(f32) + b.astype(f32)

    def erf(z):
        # Abramowitz & Stegun 7.1.26 (|err| < 1.5e-7): exact-GELU erf using Mosaic-safe ops.
        a1, a2, a3 = 0.254829592, -0.284496736, 1.421413741
        a4, a5, pp = -1.453152027, 1.061405429, 0.3275911
        az = jnp.abs(z)
        t = 1.0 / (1.0 + pp * az)
        poly = ((((a5 * t + a4) * t + a3) * t + a2) * t + a1) * t
        y = 1.0 - poly * jnp.exp(-az * az)
        return jnp.where(z >= 0, y, -y)

    def gelu(x):                 # torch.nn.GELU() default = exact (erf) formulation
        return 0.5 * x * (1.0 + erf(x * (2.0 ** -0.5)))

    # ---- patch embedding + cls token + positional embedding -------------------------
    # poscls folds (cls_token + pos[0]) on the cls row, (pos[s] + patch_b) on patch rows,
    # and zeros on pad rows -> the whole prologue is one matmul + one fused add.
    h = matmul(patches_ref[0], patch_w_ref[...]) + poscls_ref[...].astype(f32)  # [SEQ_PAD, D]

    # key-padding mask: 0 for real key positions, -inf for the SEQ..SEQ_PAD-1 pad positions.
    key_idx = jax.lax.broadcasted_iota(jnp.int32, (1, SEQ_PAD), 1)
    key_mask = jnp.where(key_idx < SEQ, 0.0, -1e30).astype(f32)

    for d in range(DEPTH):
        # ---------------- attention branch ----------------
        n1 = layernorm(h, ln1_g_ref[d], ln1_b_ref[d])
        qkv = matmul(n1, qkv_w_ref[d], qkv_b_ref[d])                  # [SEQ_PAD, 3D] f32
        heads = []
        for hh in range(NUM_HEADS):
            lo = hh * HEAD_DIM
            q = qkv[:, lo:lo + HEAD_DIM]                              # scale pre-folded in W
            k = qkv[:, EMBED_DIM + lo:EMBED_DIM + lo + HEAD_DIM]
            v = qkv[:, 2 * EMBED_DIM + lo:2 * EMBED_DIM + lo + HEAD_DIM]
            s = jnp.einsum("qd,kd->qk", q.astype(bf16), k.astype(bf16),
                           preferred_element_type=f32)                # [SEQ_PAD, SEQ_PAD]
            s = s + key_mask                                          # mask padded keys
            s = s - jnp.max(s, axis=-1, keepdims=True)
            p = jnp.exp(s)
            p = p * pl.reciprocal(jnp.sum(p, axis=-1, keepdims=True), approx=True)
            heads.append(jnp.dot(p.astype(bf16), v.astype(bf16),
                                 preferred_element_type=f32))         # [SEQ_PAD, HD]
        # lane-contiguous concat of heads -> ONE K=EMBED_DIM projection matmul
        attn = jnp.concatenate(heads, axis=-1)                        # [SEQ_PAD, D]
        h = h + matmul(attn, proj_w_ref[d], proj_b_ref[d])

        # ---------------- MLP branch ----------------
        n2 = layernorm(h, ln2_g_ref[d], ln2_b_ref[d])
        m = gelu(matmul(n2, fc1_w_ref[d], fc1_b_ref[d]))
        h = h + matmul(m, fc2_w_ref[d], fc2_b_ref[d])

    # ---- final norm + lane-dense classification head --------------------------------
    # SEQ_PAD = 8 rows = one MXU/VPU sublane tile, so this costs the same as cls-only;
    # the wrapper keeps only row 0 (the cls token).
    hf = layernorm(h, norm_g_ref[...], norm_b_ref[...])
    out_ref[0] = matmul(hf, head_w_ref[...], head_b_ref[...]).astype(out_ref.dtype)


# ----------------------------------------------------------------------------- params / wrapper
def init_params(key):
    keys = iter(jax.random.split(key, 16))

    def nrm(shape, std=0.02):
        return jax.random.normal(next(keys), shape, jnp.float32) * std

    # fold the attention scale into the q third of qkv (weights + bias) once at init
    scale_vec = jnp.concatenate([jnp.full((EMBED_DIM,), HEAD_DIM ** -0.5, jnp.float32),
                                 jnp.ones((2 * EMBED_DIM,), jnp.float32)])
    qkv_w = nrm((DEPTH, EMBED_DIM, 3 * EMBED_DIM)) * scale_vec
    qkv_b = nrm((DEPTH, 1, 3 * EMBED_DIM)) * scale_vec

    return {
        # patch conv weight stored pre-flattened as [(ph, pw, c) -> P*P*C, D] (bf16 for MXU)
        "patch_w": nrm((PPC, EMBED_DIM)).astype(jnp.bfloat16),
        "patch_b": nrm((1, EMBED_DIM)),
        "cls_token": nrm((1, EMBED_DIM)),
        "pos_embed": nrm((SEQ, EMBED_DIM)),
        # transformer blocks, stacked along a leading depth axis
        "ln1_g": jnp.ones((DEPTH, 1, EMBED_DIM), jnp.float32),
        "ln1_b": jnp.zeros((DEPTH, 1, EMBED_DIM), jnp.float32),
        "qkv_w": qkv_w.astype(jnp.bfloat16),
        "qkv_b": qkv_b,
        "proj_w": nrm((DEPTH, EMBED_DIM, EMBED_DIM)).astype(jnp.bfloat16),
        "proj_b": nrm((DEPTH, 1, EMBED_DIM)),
        "ln2_g": jnp.ones((DEPTH, 1, EMBED_DIM), jnp.float32),
        "ln2_b": jnp.zeros((DEPTH, 1, EMBED_DIM), jnp.float32),
        "fc1_w": nrm((DEPTH, EMBED_DIM, MLP_HIDDEN)).astype(jnp.bfloat16),
        "fc1_b": nrm((DEPTH, 1, MLP_HIDDEN)),
        "fc2_w": nrm((DEPTH, MLP_HIDDEN, EMBED_DIM)).astype(jnp.bfloat16),
        "fc2_b": nrm((DEPTH, 1, EMBED_DIM)),
        "norm_g": jnp.ones((1, EMBED_DIM), jnp.float32),
        "norm_b": jnp.zeros((1, EMBED_DIM), jnp.float32),
        # head padded to 128 output lanes for a lane-dense store; cols >= NUM_CLASSES are zero
        "head_w": jnp.pad(nrm((EMBED_DIM, NUM_CLASSES)),
                          ((0, 0), (0, HEAD_PAD - NUM_CLASSES))).astype(jnp.bfloat16),
        "head_b": jnp.zeros((1, HEAD_PAD), jnp.float32),
    }


def vit_forward(params, x):
    """x: [B, C, H, W] (NCHW, matches the PyTorch module input)."""
    B, C, H, W = x.shape
    gh, gw = H // PATCH, W // PATCH

    # Patch extraction once, in NHWC order (near-contiguous flatten); flatten order (ph, pw, c)
    # matches the [P*P*C, D] layout of patch_w. Row 0 = zero "cls slot", rows SEQ.. = zero pad.
    xh = jnp.transpose(x, (0, 2, 3, 1))                                    # NHWC
    pch = xh.reshape(B, gh, PATCH, gw, PATCH, C).transpose(0, 1, 3, 2, 4, 5)
    pch = pch.reshape(B, gh * gw, PPC)
    patches = jnp.concatenate(
        [jnp.zeros((B, 1, PPC), pch.dtype), pch,
         jnp.zeros((B, SEQ_PAD - SEQ, PPC), pch.dtype)], axis=1)
    patches = patches.astype(jnp.bfloat16)                                 # [B, SEQ_PAD, PPC]

    # [SEQ_PAD, D] additive table: cls row = cls+pos[0]; patch rows = pos[s]+patch_b; pads = 0.
    poscls = jnp.concatenate(
        [params["cls_token"] + params["pos_embed"][0:1],
         params["pos_embed"][1:] + params["patch_b"],
         jnp.zeros((SEQ_PAD - SEQ, EMBED_DIM), jnp.float32)], axis=0)

    weight_args = (params["patch_w"], poscls,
                   params["ln1_g"], params["ln1_b"], params["qkv_w"], params["qkv_b"],
                   params["proj_w"], params["proj_b"], params["ln2_g"], params["ln2_b"],
                   params["fc1_w"], params["fc1_b"], params["fc2_w"], params["fc2_b"],
                   params["norm_g"], params["norm_b"], params["head_w"], params["head_b"])

    # Per-image blocks for patches/output, constant index_maps for (VMEM-resident) weights.
    in_specs = [pl.BlockSpec((1, SEQ_PAD, PPC), lambda b: (b, 0, 0))] + [
        pl.BlockSpec(a.shape, (lambda b, _z=(0,) * a.ndim: _z)) for a in weight_args
    ]

    out = pl.pallas_call(
        _vit_kernel,
        out_shape=jax.ShapeDtypeStruct((B, SEQ_PAD, HEAD_PAD), jnp.float32),
        grid=(B,),
        in_specs=in_specs,
        out_specs=pl.BlockSpec((1, SEQ_PAD, HEAD_PAD), lambda b: (b, 0, 0)),
        compiler_params=pltpu.CompilerParams(dimension_semantics=("parallel",)),
    )(patches, *weight_args)

    # keep the cls-token row of each image, drop class padding
    return out[:, 0, :NUM_CLASSES]


if __name__ == "__main__":
    key = jax.random.PRNGKey(0)
    pkey, xkey = jax.random.split(key)
    params = init_params(pkey)
    x = jax.random.normal(xkey, (2, IN_CHANS, IMG, IMG), jnp.float32)      # NCHW input

    logits = jax.jit(vit_forward)(params, x)
    jax.block_until_ready(logits)
    assert logits.shape == (2, NUM_CLASSES)
    assert bool(jnp.all(jnp.isfinite(logits)))
    print("KERNEL_OK")
</pallas_src>

<mosaic_0001>
module attributes {stable_mosaic.version = 11 : i64} {
  func.func @_vit_kernel(%arg0: i32, %arg1: memref<1x8x768xbf16, #tpu.memory_space<vmem>>, %arg2: memref<768x64xbf16, #tpu.memory_space<vmem>>, %arg3: memref<8x64xf32, #tpu.memory_space<vmem>>, %arg4: memref<2x1x64xf32, #tpu.memory_space<vmem>>, %arg5: memref<2x1x64xf32, #tpu.memory_space<vmem>>, %arg6: memref<2x64x192xbf16, #tpu.memory_space<vmem>>, %arg7: memref<2x1x192xf32, #tpu.memory_space<vmem>>, %arg8: memref<2x64x64xbf16, #tpu.memory_space<vmem>>, %arg9: memref<2x1x64xf32, #tpu.memory_space<vmem>>, %arg10: memref<2x1x64xf32, #tpu.memory_space<vmem>>, %arg11: memref<2x1x64xf32, #tpu.memory_space<vmem>>, %arg12: memref<2x64x256xbf16, #tpu.memory_space<vmem>>, %arg13: memref<2x1x256xf32, #tpu.memory_space<vmem>>, %arg14: memref<2x256x64xbf16, #tpu.memory_space<vmem>>, %arg15: memref<2x1x64xf32, #tpu.memory_space<vmem>>, %arg16: memref<1x64xf32, #tpu.memory_space<vmem>>, %arg17: memref<1x64xf32, #tpu.memory_space<vmem>>, %arg18: memref<64x128xbf16, #tpu.memory_space<vmem>>, %arg19: memref<1x128xf32, #tpu.memory_space<vmem>>, %arg20: memref<1x8x128xf32, #tpu.memory_space<vmem>>) attributes {dimension_semantics = [#tpu.dimension_semantics<parallel>], iteration_bounds = array<i64: 2>, scalar_prefetch = 0 : i64, scratch_operands = 0 : i64, tpu.core_type = #tpu.core_type<tc>, window_params = [{transform_indices = @transform_0, window_bounds = array<i64: 1, 8, 768>}, {pipeline_mode = #tpu.pipeline_mode<synchronous>, transform_indices = @transform_1, window_bounds = array<i64: 768, 64>}, {pipeline_mode = #tpu.pipeline_mode<synchronous>, transform_indices = @transform_2, window_bounds = array<i64: 8, 64>}, {pipeline_mode = #tpu.pipeline_mode<synchronous>, transform_indices = @transform_3, window_bounds = array<i64: 2, 1, 64>}, {pipeline_mode = #tpu.pipeline_mode<synchronous>, transform_indices = @transform_4, window_bounds = array<i64: 2, 1, 64>}, {pipeline_mode = #tpu.pipeline_mode<synchronous>, transform_indices = @transform_5, window_bounds = array<i64: 2, 64, 192>}, {pipeline_mode = #tpu.pipeline_mode<synchronous>, transform_indices = @transform_6, window_bounds = array<i64: 2, 1, 192>}, {pipeline_mode = #tpu.pipeline_mode<synchronous>, transform_indices = @transform_7, window_bounds = array<i64: 2, 64, 64>}, {pipeline_mode = #tpu.pipeline_mode<synchronous>, transform_indices = @transform_8, window_bounds = array<i64: 2, 1, 64>}, {pipeline_mode = #tpu.pipeline_mode<synchronous>, transform_indices = @transform_9, window_bounds = array<i64: 2, 1, 64>}, {pipeline_mode = #tpu.pipeline_mode<synchronous>, transform_indices = @transform_10, window_bounds = array<i64: 2, 1, 64>}, {pipeline_mode = #tpu.pipeline_mode<synchronous>, transform_indices = @transform_11, window_bounds = array<i64: 2, 64, 256>}, {pipeline_mode = #tpu.pipeline_mode<synchronous>, transform_indices = @transform_12, window_bounds = array<i64: 2, 1, 256>}, {pipeline_mode = #tpu.pipeline_mode<synchronous>, transform_indices = @transform_13, window_bounds = array<i64: 2, 256, 64>}, {pipeline_mode = #tpu.pipeline_mode<synchronous>, transform_indices = @transform_14, window_bounds = array<i64: 2, 1, 64>}, {pipeline_mode = #tpu.pipeline_mode<synchronous>, transform_indices = @transform_15, window_bounds = array<i64: 1, 64>}, {pipeline_mode = #tpu.pipeline_mode<synchronous>, transform_indices = @transform_16, window_bounds = array<i64: 1, 64>}, {pipeline_mode = #tpu.pipeline_mode<synchronous>, transform_indices = @transform_17, window_bounds = array<i64: 64, 128>}, {pipeline_mode = #tpu.pipeline_mode<synchronous>, transform_indices = @transform_18, window_bounds = array<i64: 1, 128>}, {transform_indices = @transform_19, window_bounds = array<i64: 1, 8, 128>}]} {
    %c0 = arith.constant 0 : index
    %c0_0 = arith.constant 0 : index
    %c0_1 = arith.constant 0 : index
    %0 = vector.load %arg1[%c0, %c0_0, %c0_1] : memref<1x8x768xbf16, #tpu.memory_space<vmem>>, vector<1x8x768xbf16>
    %1 = vector.shape_cast %0 : vector<1x8x768xbf16> to vector<8x768xbf16>
    %c0_2 = arith.constant 0 : index
    %c0_3 = arith.constant 0 : index
    %2 = vector.load %arg2[%c0_2, %c0_3] : memref<768x64xbf16, #tpu.memory_space<vmem>>, vector<768x64xbf16>
    %cst = arith.constant dense<0.000000e+00> : vector<8x64xf32>
    %3 = tpu.matmul %1, %2, %cst {dimension_numbers = #tpu.dot_dimension_numbers<[1], [0], [0], [1], [0, 0, 1, 1], [], []>} : vector<8x768xbf16>, vector<768x64xbf16>, vector<8x64xf32> -> vector<8x64xf32>
    %c0_4 = arith.constant 0 : index
    %c0_5 = arith.constant 0 : index
    %4 = vector.load %arg3[%c0_4, %c0_5] : memref<8x64xf32, #tpu.memory_space<vmem>>, vector<8x64xf32>
    %5 = arith.addf %3, %4 : vector<8x64xf32>
    %6 = tpu.iota {dimensions = array<i32: 1>} : vector<1x8xi32>
    %c5_i32 = arith.constant 5 : i32
    %7 = vector.broadcast %c5_i32 : i32 to vector<1x8xi32>
    %8 = arith.cmpi slt, %6, %7 : vector<1x8xi32>
    %cst_6 = arith.constant 0.000000e+00 : f32
    %cst_7 = arith.constant -1.000000e+30 : f32
    %9 = vector.broadcast %cst_6 : f32 to vector<1x8xf32>
    %10 = vector.broadcast %cst_7 : f32 to vector<1x8xf32>
    %11 = arith.select %8, %9, %10 : vector<1x8xi1>, vector<1x8xf32>
    %c0_8 = arith.constant 0 : index
    %c0_9 = arith.constant 0 : index
    %c0_10 = arith.constant 0 : index
    %12 = vector.load %arg4[%c0_8, %c0_9, %c0_10] : memref<2x1x64xf32, #tpu.memory_space<vmem>>, vector<1x1x64xf32>
    %13 = vector.shape_cast %12 : vector<1x1x64xf32> to vector<1x64xf32>
    %c0_11 = arith.constant 0 : index
    %c0_12 = arith.constant 0 : index
    %c0_13 = arith.constant 0 : index
    %14 = vector.load %arg5[%c0_11, %c0_12, %c0_13] : memref<2x1x64xf32, #tpu.memory_space<vmem>>, vector<1x1x64xf32>
    %15 = vector.shape_cast %14 : vector<1x1x64xf32> to vector<1x64xf32>
    %cst_14 = arith.constant dense<0.000000e+00> : vector<8xf32>
    %16 = vector.multi_reduction <add>, %5, %cst_14 [1] : vector<8x64xf32> to vector<8xf32>
    %17 = vector.shape_cast %16 : vector<8xf32> to vector<8x1xf32>
    %cst_15 = arith.constant 6.400000e+01 : f32
    %18 = vector.broadcast %cst_15 : f32 to vector<8x1xf32>
    %19 = arith.divf %17, %18 : vector<8x1xf32>
    %20 = vector.broadcast %19 : vector<8x1xf32> to vector<8x64xf32>
    %21 = arith.subf %5, %20 : vector<8x64xf32>
    %22 = arith.mulf %21, %21 : vector<8x64xf32>
    %cst_16 = arith.constant dense<0.000000e+00> : vector<8xf32>
    %23 = vector.multi_reduction <add>, %22, %cst_16 [1] : vector<8x64xf32> to vector<8xf32>
    %24 = vector.shape_cast %23 : vector<8xf32> to vector<8x1xf32>
    %cst_17 = arith.constant 6.400000e+01 : f32
    %25 = vector.broadcast %cst_17 : f32 to vector<8x1xf32>
    %26 = arith.divf %24, %25 : vector<8x1xf32>
    %cst_18 = arith.constant 9.99999997E-7 : f32
    %27 = vector.broadcast %cst_18 : f32 to vector<8x1xf32>
    %28 = arith.addf %26, %27 : vector<8x1xf32>
    %29 = math.rsqrt %28 : vector<8x1xf32>
    %30 = vector.broadcast %29 : vector<8x1xf32> to vector<8x64xf32>
    %31 = arith.mulf %21, %30 : vector<8x64xf32>
    %32 = vector.broadcast %13 : vector<1x64xf32> to vector<8x64xf32>
    %33 = arith.mulf %31, %32 : vector<8x64xf32>
    %34 = vector.broadcast %15 : vector<1x64xf32> to vector<8x64xf32>
    %35 = arith.addf %33, %34 : vector<8x64xf32>
    %c0_19 = arith.constant 0 : index
    %c0_20 = arith.constant 0 : index
    %c0_21 = arith.constant 0 : index
    %36 = vector.load %arg6[%c0_19, %c0_20, %c0_21] : memref<2x64x192xbf16, #tpu.memory_space<vmem>>, vector<1x64x192xbf16>
    %37 = vector.shape_cast %36 : vector<1x64x192xbf16> to vector<64x192xbf16>
    %c0_22 = arith.constant 0 : index
    %c0_23 = arith.constant 0 : index
    %c0_24 = arith.constant 0 : index
    %38 = vector.load %arg7[%c0_22, %c0_23, %c0_24] : memref<2x1x192xf32, #tpu.memory_space<vmem>>, vector<1x1x192xf32>
    %39 = vector.shape_cast %38 : vector<1x1x192xf32> to vector<1x192xf32>
    %40 = arith.truncf %35 : vector<8x64xf32> to vector<8x64xbf16>
    %cst_25 = arith.constant dense<0.000000e+00> : vector<8x192xf32>
    %41 = tpu.matmul %40, %37, %cst_25 {dimension_numbers = #tpu.dot_dimension_numbers<[1], [0], [0], [1], [0, 0, 1, 1], [], []>} : vector<8x64xbf16>, vector<64x192xbf16>, vector<8x192xf32> -> vector<8x192xf32>
    %42 = vector.broadcast %39 : vector<1x192xf32> to vector<8x192xf32>
    %43 = arith.addf %41, %42 : vector<8x192xf32>
    %44 = vector.extract_strided_slice %43 {offsets = [0, 0], sizes = [8, 16], strides = [1, 1]} : vector<8x192xf32> to vector<8x16xf32>
    %45 = vector.extract_strided_slice %43 {offsets = [0, 64], sizes = [8, 16], strides = [1, 1]} : vector<8x192xf32> to vector<8x16xf32>
    %46 = vector.extract_strided_slice %43 {offsets = [0, 128], sizes = [8, 16], strides = [1, 1]} : vector<8x192xf32> to vector<8x16xf32>
    %47 = arith.truncf %44 : vector<8x16xf32> to vector<8x16xbf16>
    %48 = arith.truncf %45 : vector<8x16xf32> to vector<8x16xbf16>
    "tpu.trace_start"() <{level = 10 : i32, message = "qd,kd->qk"}> : () -> ()
    %cst_26 = arith.constant dense<0.000000e+00> : vector<8x8xf32>
    %49 = tpu.matmul %47, %48, %cst_26 {dimension_numbers = #tpu.dot_dimension_numbers<[1], [1], [0], [0], [0, 0, 1, 0], [], []>} : vector<8x16xbf16>, vector<8x16xbf16>, vector<8x8xf32> -> vector<8x8xf32>
    "tpu.trace_stop"() : () -> ()
    %50 = vector.broadcast %11 : vector<1x8xf32> to vector<8x8xf32>
    %51 = arith.addf %49, %50 : vector<8x8xf32>
    %cst_27 = arith.constant dense<0xFF800000> : vector<8xf32>
    %52 = vector.multi_reduction <maximumf>, %51, %cst_27 [1] : vector<8x8xf32> to vector<8xf32>
    %53 = vector.shape_cast %52 : vector<8xf32> to vector<8x1xf32>
    %54 = vector.broadcast %53 : vector<8x1xf32> to vector<8x8xf32>
    %55 = arith.subf %51, %54 : vector<8x8xf32>
    %56 = math.exp %55 : vector<8x8xf32>
    %cst_28 = arith.constant dense<0.000000e+00> : vector<8xf32>
    %57 = vector.multi_reduction <add>, %56, %cst_28 [1] : vector<8x8xf32> to vector<8xf32>
    %58 = vector.shape_cast %57 : vector<8xf32> to vector<8x1xf32>
    %59 = tpu.reciprocal %58 {approx = true} : vector<8x1xf32> -> vector<8x1xf32>
    %60 = vector.broadcast %59 : vector<8x1xf32> to vector<8x8xf32>
    %61 = arith.mulf %56, %60 : vector<8x8xf32>
    %62 = arith.truncf %61 : vector<8x8xf32> to vector<8x8xbf16>
    %63 = arith.truncf %46 : vector<8x16xf32> to vector<8x16xbf16>
    %cst_29 = arith.constant dense<0.000000e+00> : vector<8x16xf32>
    %64 = tpu.matmul %62, %63, %cst_29 {dimension_numbers = #tpu.dot_dimension_numbers<[1], [0], [0], [1], [0, 0, 1, 1], [], []>} : vector<8x8xbf16>, vector<8x16xbf16>, vector<8x16xf32> -> vector<8x16xf32>
    %65 = vector.extract_strided_slice %43 {offsets = [0, 16], sizes = [8, 16], strides = [1, 1]} : vector<8x192xf32> to vector<8x16xf32>
    %66 = vector.extract_strided_slice %43 {offsets = [0, 80], sizes = [8, 16], strides = [1, 1]} : vector<8x192xf32> to vector<8x16xf32>
    %67 = vector.extract_strided_slice %43 {offsets = [0, 144], sizes = [8, 16], strides = [1, 1]} : vector<8x192xf32> to vector<8x16xf32>
    %68 = arith.truncf %65 : vector<8x16xf32> to vector<8x16xbf16>
    %69 = arith.truncf %66 : vector<8x16xf32> to vector<8x16xbf16>
    "tpu.trace_start"() <{level = 10 : i32, message = "qd,kd->qk"}> : () -> ()
    %cst_30 = arith.constant dense<0.000000e+00> : vector<8x8xf32>
    %70 = tpu.matmul %68, %69, %cst_30 {dimension_numbers = #tpu.dot_dimension_numbers<[1], [1], [0], [0], [0, 0, 1, 0], [], []>} : vector<8x16xbf16>, vector<8x16xbf16>, vector<8x8xf32> -> vector<8x8xf32>
    "tpu.trace_stop"() : () -> ()
    %71 = vector.broadcast %11 : vector<1x8xf32> to vector<8x8xf32>
    %72 = arith.addf %70, %71 : vector<8x8xf32>
    %cst_31 = arith.constant dense<0xFF800000> : vector<8xf32>
    %73 = vector.multi_reduction <maximumf>, %72, %cst_31 [1] : vector<8x8xf32> to vector<8xf32>
    %74 = vector.shape_cast %73 : vector<8xf32> to vector<8x1xf32>
    %75 = vector.broadcast %74 : vector<8x1xf32> to vector<8x8xf32>
    %76 = arith.subf %72, %75 : vector<8x8xf32>
    %77 = math.exp %76 : vector<8x8xf32>
    %cst_32 = arith.constant dense<0.000000e+00> : vector<8xf32>
    %78 = vector.multi_reduction <add>, %77, %cst_32 [1] : vector<8x8xf32> to vector<8xf32>
    %79 = vector.shape_cast %78 : vector<8xf32> to vector<8x1xf32>
    %80 = tpu.reciprocal %79 {approx = true} : vector<8x1xf32> -> vector<8x1xf32>
    %81 = vector.broadcast %80 : vector<8x1xf32> to vector<8x8xf32>
    %82 = arith.mulf %77, %81 : vector<8x8xf32>
    %83 = arith.truncf %82 : vector<8x8xf32> to vector<8x8xbf16>
    %84 = arith.truncf %67 : vector<8x16xf32> to vector<8x16xbf16>
    %cst_33 = arith.constant dense<0.000000e+00> : vector<8x16xf32>
    %85 = tpu.matmul %83, %84, %cst_33 {dimension_numbers = #tpu.dot_dimension_numbers<[1], [0], [0], [1], [0, 0, 1, 1], [], []>} : vector<8x8xbf16>, vector<8x16xbf16>, vector<8x16xf32> -> vector<8x16xf32>
    %86 = vector.extract_strided_slice %43 {offsets = [0, 32], sizes = [8, 16], strides = [1, 1]} : vector<8x192xf32> to vector<8x16xf32>
    %87 = vector.extract_strided_slice %43 {offsets = [0, 96], sizes = [8, 16], strides = [1, 1]} : vector<8x192xf32> to vector<8x16xf32>
    %88 = vector.extract_strided_slice %43 {offsets = [0, 160], sizes = [8, 16], strides = [1, 1]} : vector<8x192xf32> to vector<8x16xf32>
    %89 = arith.truncf %86 : vector<8x16xf32> to vector<8x16xbf16>
    %90 = arith.truncf %87 : vector<8x16xf32> to vector<8x16xbf16>
    "tpu.trace_start"() <{level = 10 : i32, message = "qd,kd->qk"}> : () -> ()
    %cst_34 = arith.constant dense<0.000000e+00> : vector<8x8xf32>
    %91 = tpu.matmul %89, %90, %cst_34 {dimension_numbers = #tpu.dot_dimension_numbers<[1], [1], [0], [0], [0, 0, 1, 0], [], []>} : vector<8x16xbf16>, vector<8x16xbf16>, vector<8x8xf32> -> vector<8x8xf32>
    "tpu.trace_stop"() : () -> ()
    %92 = vector.broadcast %11 : vector<1x8xf32> to vector<8x8xf32>
    %93 = arith.addf %91, %92 : vector<8x8xf32>
    %cst_35 = arith.constant dense<0xFF800000> : vector<8xf32>
    %94 = vector.multi_reduction <maximumf>, %93, %cst_35 [1] : vector<8x8xf32> to vector<8xf32>
    %95 = vector.shape_cast %94 : vector<8xf32> to vector<8x1xf32>
    %96 = vector.broadcast %95 : vector<8x1xf32> to vector<8x8xf32>
    %97 = arith.subf %93, %96 : vector<8x8xf32>
    %98 = math.exp %97 : vector<8x8xf32>
    %cst_36 = arith.constant dense<0.000000e+00> : vector<8xf32>
    %99 = vector.multi_reduction <add>, %98, %cst_36 [1] : vector<8x8xf32> to vector<8xf32>
    %100 = vector.shape_cast %99 : vector<8xf32> to vector<8x1xf32>
    %101 = tpu.reciprocal %100 {approx = true} : vector<8x1xf32> -> vector<8x1xf32>
    %102 = vector.broadcast %101 : vector<8x1xf32> to vector<8x8xf32>
    %103 = arith.mulf %98, %102 : vector<8x8xf32>
    %104 = arith.truncf %103 : vector<8x8xf32> to vector<8x8xbf16>
    %105 = arith.truncf %88 : vector<8x16xf32> to vector<8x16xbf16>
    %cst_37 = arith.constant dense<0.000000e+00> : vector<8x16xf32>
    %106 = tpu.matmul %104, %105, %cst_37 {dimension_numbers = #tpu.dot_dimension_numbers<[1], [0], [0], [1], [0, 0, 1, 1], [], []>} : vector<8x8xbf16>, vector<8x16xbf16>, vector<8x16xf32> -> vector<8x16xf32>
    %107 = vector.extract_strided_slice %43 {offsets = [0, 48], sizes = [8, 16], strides = [1, 1]} : vector<8x192xf32> to vector<8x16xf32>
    %108 = vector.extract_strided_slice %43 {offsets = [0, 112], sizes = [8, 16], strides = [1, 1]} : vector<8x192xf32> to vector<8x16xf32>
    %109 = vector.extract_strided_slice %43 {offsets = [0, 176], sizes = [8, 16], strides = [1, 1]} : vector<8x192xf32> to vector<8x16xf32>
    %110 = arith.truncf %107 : vector<8x16xf32> to vector<8x16xbf16>
    %111 = arith.truncf %108 : vector<8x16xf32> to vector<8x16xbf16>
    "tpu.trace_start"() <{level = 10 : i32, message = "qd,kd->qk"}> : () -> ()
    %cst_38 = arith.constant dense<0.000000e+00> : vector<8x8xf32>
    %112 = tpu.matmul %110, %111, %cst_38 {dimension_numbers = #tpu.dot_dimension_numbers<[1], [1], [0], [0], [0, 0, 1, 0], [], []>} : vector<8x16xbf16>, vector<8x16xbf16>, vector<8x8xf32> -> vector<8x8xf32>
    "tpu.trace_stop"() : () -> ()
    %113 = vector.broadcast %11 : vector<1x8xf32> to vector<8x8xf32>
    %114 = arith.addf %112, %113 : vector<8x8xf32>
    %cst_39 = arith.constant dense<0xFF800000> : vector<8xf32>
    %115 = vector.multi_reduction <maximumf>, %114, %cst_39 [1] : vector<8x8xf32> to vector<8xf32>
    %116 = vector.shape_cast %115 : vector<8xf32> to vector<8x1xf32>
    %117 = vector.broadcast %116 : vector<8x1xf32> to vector<8x8xf32>
    %118 = arith.subf %114, %117 : vector<8x8xf32>
    %119 = math.exp %118 : vector<8x8xf32>
    %cst_40 = arith.constant dense<0.000000e+00> : vector<8xf32>
    %120 = vector.multi_reduction <add>, %119, %cst_40 [1] : vector<8x8xf32> to vector<8xf32>
    %121 = vector.shape_cast %120 : vector<8xf32> to vector<8x1xf32>
    %122 = tpu.reciprocal %121 {approx = true} : vector<8x1xf32> -> vector<8x1xf32>
    %123 = vector.broadcast %122 : vector<8x1xf32> to vector<8x8xf32>
    %124 = arith.mulf %119, %123 : vector<8x8xf32>
    %125 = arith.truncf %124 : vector<8x8xf32> to vector<8x8xbf16>
    %126 = arith.truncf %109 : vector<8x16xf32> to vector<8x16xbf16>
    %cst_41 = arith.constant dense<0.000000e+00> : vector<8x16xf32>
    %127 = tpu.matmul %125, %126, %cst_41 {dimension_numbers = #tpu.dot_dimension_numbers<[1], [0], [0], [1], [0, 0, 1, 1], [], []>} : vector<8x8xbf16>, vector<8x16xbf16>, vector<8x16xf32> -> vector<8x16xf32>
    %128 = tpu.concatenate %64, %85, %106, %127 in 1 : vector<8x16xf32>, vector<8x16xf32>, vector<8x16xf32>, vector<8x16xf32> -> vector<8x64xf32>
    %c0_42 = arith.constant 0 : index
    %c0_43 = arith.constant 0 : index
    %c0_44 = arith.constant 0 : index
    %129 = vector.load %arg8[%c0_42, %c0_43, %c0_44] : memref<2x64x64xbf16, #tpu.memory_space<vmem>>, vector<1x64x64xbf16>
    %130 = vector.shape_cast %129 : vector<1x64x64xbf16> to vector<64x64xbf16>
    %c0_45 = arith.constant 0 : index
    %c0_46 = arith.constant 0 : index
    %c0_47 = arith.constant 0 : index
    %131 = vector.load %arg9[%c0_45, %c0_46, %c0_47] : memref<2x1x64xf32, #tpu.memory_space<vmem>>, vector<1x1x64xf32>
    %132 = vector.shape_cast %131 : vector<1x1x64xf32> to vector<1x64xf32>
    %133 = arith.truncf %128 : vector<8x64xf32> to vector<8x64xbf16>
    %cst_48 = arith.constant dense<0.000000e+00> : vector<8x64xf32>
    %134 = tpu.matmul %133, %130, %cst_48 {dimension_numbers = #tpu.dot_dimension_numbers<[1], [0], [0], [1], [0, 0, 1, 1], [], []>} : vector<8x64xbf16>, vector<64x64xbf16>, vector<8x64xf32> -> vector<8x64xf32>
    %135 = vector.broadcast %132 : vector<1x64xf32> to vector<8x64xf32>
    %136 = arith.addf %134, %135 : vector<8x64xf32>
    %137 = arith.addf %5, %136 : vector<8x64xf32>
    %c0_49 = arith.constant 0 : index
    %c0_50 = arith.constant 0 : index
    %c0_51 = arith.constant 0 : index
    %138 = vector.load %arg10[%c0_49, %c0_50, %c0_51] : memref<2x1x64xf32, #tpu.memory_space<vmem>>, vector<1x1x64xf32>
    %139 = vector.shape_cast %138 : vector<1x1x64xf32> to vector<1x64xf32>
    %c0_52 = arith.constant 0 : index
    %c0_53 = arith.constant 0 : index
    %c0_54 = arith.constant 0 : index
    %140 = vector.load %arg11[%c0_52, %c0_53, %c0_54] : memref<2x1x64xf32, #tpu.memory_space<vmem>>, vector<1x1x64xf32>
    %141 = vector.shape_cast %140 : vector<1x1x64xf32> to vector<1x64xf32>
    %cst_55 = arith.constant dense<0.000000e+00> : vector<8xf32>
    %142 = vector.multi_reduction <add>, %137, %cst_55 [1] : vector<8x64xf32> to vector<8xf32>
    %143 = vector.shape_cast %142 : vector<8xf32> to vector<8x1xf32>
    %cst_56 = arith.constant 6.400000e+01 : f32
    %144 = vector.broadcast %cst_56 : f32 to vector<8x1xf32>
    %145 = arith.divf %143, %144 : vector<8x1xf32>
    %146 = vector.broadcast %145 : vector<8x1xf32> to vector<8x64xf32>
    %147 = arith.subf %137, %146 : vector<8x64xf32>
    %148 = arith.mulf %147, %147 : vector<8x64xf32>
    %cst_57 = arith.constant dense<0.000000e+00> : vector<8xf32>
    %149 = vector.multi_reduction <add>, %148, %cst_57 [1] : vector<8x64xf32> to vector<8xf32>
    %150 = vector.shape_cast %149 : vector<8xf32> to vector<8x1xf32>
    %cst_58 = arith.constant 6.400000e+01 : f32
    %151 = vector.broadcast %cst_58 : f32 to vector<8x1xf32>
    %152 = arith.divf %150, %151 : vector<8x1xf32>
    %cst_59 = arith.constant 9.99999997E-7 : f32
    %153 = vector.broadcast %cst_59 : f32 to vector<8x1xf32>
    %154 = arith.addf %152, %153 : vector<8x1xf32>
    %155 = math.rsqrt %154 : vector<8x1xf32>
    %156 = vector.broadcast %155 : vector<8x1xf32> to vector<8x64xf32>
    %157 = arith.mulf %147, %156 : vector<8x64xf32>
    %158 = vector.broadcast %139 : vector<1x64xf32> to vector<8x64xf32>
    %159 = arith.mulf %157, %158 : vector<8x64xf32>
    %160 = vector.broadcast %141 : vector<1x64xf32> to vector<8x64xf32>
    %161 = arith.addf %159, %160 : vector<8x64xf32>
    %c0_60 = arith.constant 0 : index
    %c0_61 = arith.constant 0 : index
    %c0_62 = arith.constant 0 : index
    %162 = vector.load %arg12[%c0_60, %c0_61, %c0_62] : memref<2x64x256xbf16, #tpu.memory_space<vmem>>, vector<1x64x256xbf16>
    %163 = vector.shape_cast %162 : vector<1x64x256xbf16> to vector<64x256xbf16>
    %c0_63 = arith.constant 0 : index
    %c0_64 = arith.constant 0 : index
    %c0_65 = arith.constant 0 : index
    %164 = vector.load %arg13[%c0_63, %c0_64, %c0_65] : memref<2x1x256xf32, #tpu.memory_space<vmem>>, vector<1x1x256xf32>
    %165 = vector.shape_cast %164 : vector<1x1x256xf32> to vector<1x256xf32>
    %166 = arith.truncf %161 : vector<8x64xf32> to vector<8x64xbf16>
    %cst_66 = arith.constant dense<0.000000e+00> : vector<8x256xf32>
    %167 = tpu.matmul %166, %163, %cst_66 {dimension_numbers = #tpu.dot_dimension_numbers<[1], [0], [0], [1], [0, 0, 1, 1], [], []>} : vector<8x64xbf16>, vector<64x256xbf16>, vector<8x256xf32> -> vector<8x256xf32>
    %168 = vector.broadcast %165 : vector<1x256xf32> to vector<8x256xf32>
    %169 = arith.addf %167, %168 : vector<8x256xf32>
    %cst_67 = arith.constant 5.000000e-01 : f32
    %170 = vector.broadcast %cst_67 : f32 to vector<8x256xf32>
    %171 = arith.mulf %170, %169 : vector<8x256xf32>
    %cst_68 = arith.constant 0.707106769 : f32
    %172 = vector.broadcast %cst_68 : f32 to vector<8x256xf32>
    %173 = arith.mulf %169, %172 : vector<8x256xf32>
    %174 = math.absf %173 : vector<8x256xf32>
    %cst_69 = arith.constant 0.327591091 : f32
    %175 = vector.broadcast %cst_69 : f32 to vector<8x256xf32>
    %176 = arith.mulf %175, %174 : vector<8x256xf32>
    %cst_70 = arith.constant 1.000000e+00 : f32
    %177 = vector.broadcast %cst_70 : f32 to vector<8x256xf32>
    %178 = arith.addf %177, %176 : vector<8x256xf32>
    %cst_71 = arith.constant 1.000000e+00 : f32
    %179 = vector.broadcast %cst_71 : f32 to vector<8x256xf32>
    %180 = arith.divf %179, %178 : vector<8x256xf32>
    %cst_72 = arith.constant 1.06140542 : f32
    %181 = vector.broadcast %cst_72 : f32 to vector<8x256xf32>
    %182 = arith.mulf %181, %180 : vector<8x256xf32>
    %cst_73 = arith.constant -1.45315206 : f32
    %183 = vector.broadcast %cst_73 : f32 to vector<8x256xf32>
    %184 = arith.addf %182, %183 : vector<8x256xf32>
    %185 = arith.mulf %184, %180 : vector<8x256xf32>
    %cst_74 = arith.constant 1.42141378 : f32
    %186 = vector.broadcast %cst_74 : f32 to vector<8x256xf32>
    %187 = arith.addf %185, %186 : vector<8x256xf32>
    %188 = arith.mulf %187, %180 : vector<8x256xf32>
    %cst_75 = arith.constant -0.284496725 : f32
    %189 = vector.broadcast %cst_75 : f32 to vector<8x256xf32>
    %190 = arith.addf %188, %189 : vector<8x256xf32>
    %191 = arith.mulf %190, %180 : vector<8x256xf32>
    %cst_76 = arith.constant 0.254829586 : f32
    %192 = vector.broadcast %cst_76 : f32 to vector<8x256xf32>
    %193 = arith.addf %191, %192 : vector<8x256xf32>
    %194 = arith.mulf %193, %180 : vector<8x256xf32>
    %cst_77 = arith.constant 0.000000e+00 : f32
    %195 = vector.broadcast %cst_77 : f32 to vector<8x256xf32>
    %196 = arith.subf %195, %174 : vector<8x256xf32>
    %197 = arith.mulf %196, %174 : vector<8x256xf32>
    %198 = math.exp %197 : vector<8x256xf32>
    %199 = arith.mulf %194, %198 : vector<8x256xf32>
    %cst_78 = arith.constant 1.000000e+00 : f32
    %200 = vector.broadcast %cst_78 : f32 to vector<8x256xf32>
    %201 = arith.subf %200, %199 : vector<8x256xf32>
    %cst_79 = arith.constant 0.000000e+00 : f32
    %202 = vector.broadcast %cst_79 : f32 to vector<8x256xf32>
    %203 = arith.cmpf oge, %173, %202 : vector<8x256xf32>
    %cst_80 = arith.constant 0.000000e+00 : f32
    %204 = vector.broadcast %cst_80 : f32 to vector<8x256xf32>
    %205 = arith.subf %204, %201 : vector<8x256xf32>
    %206 = arith.select %203, %201, %205 : vector<8x256xi1>, vector<8x256xf32>
    %cst_81 = arith.constant 1.000000e+00 : f32
    %207 = vector.broadcast %cst_81 : f32 to vector<8x256xf32>
    %208 = arith.addf %207, %206 : vector<8x256xf32>
    %209 = arith.mulf %171, %208 : vector<8x256xf32>
    %c0_82 = arith.constant 0 : index
    %c0_83 = arith.constant 0 : index
    %c0_84 = arith.constant 0 : index
    %210 = vector.load %arg14[%c0_82, %c0_83, %c0_84] : memref<2x256x64xbf16, #tpu.memory_space<vmem>>, vector<1x256x64xbf16>
    %211 = vector.shape_cast %210 : vector<1x256x64xbf16> to vector<256x64xbf16>
    %c0_85 = arith.constant 0 : index
    %c0_86 = arith.constant 0 : index
    %c0_87 = arith.constant 0 : index
    %212 = vector.load %arg15[%c0_85, %c0_86, %c0_87] : memref<2x1x64xf32, #tpu.memory_space<vmem>>, vector<1x1x64xf32>
    %213 = vector.shape_cast %212 : vector<1x1x64xf32> to vector<1x64xf32>
    %214 = arith.truncf %209 : vector<8x256xf32> to vector<8x256xbf16>
    %cst_88 = arith.constant dense<0.000000e+00> : vector<8x64xf32>
    %215 = tpu.matmul %214, %211, %cst_88 {dimension_numbers = #tpu.dot_dimension_numbers<[1], [0], [0], [1], [0, 0, 1, 1], [], []>} : vector<8x256xbf16>, vector<256x64xbf16>, vector<8x64xf32> -> vector<8x64xf32>
    %216 = vector.broadcast %213 : vector<1x64xf32> to vector<8x64xf32>
    %217 = arith.addf %215, %216 : vector<8x64xf32>
    %218 = arith.addf %137, %217 : vector<8x64xf32>
    %c1 = arith.constant 1 : index
    %c0_89 = arith.constant 0 : index
    %c0_90 = arith.constant 0 : index
    %219 = vector.load %arg4[%c1, %c0_89, %c0_90] : memref<2x1x64xf32, #tpu.memory_space<vmem>>, vector<1x1x64xf32>
    %220 = vector.shape_cast %219 : vector<1x1x64xf32> to vector<1x64xf32>
    %c1_91 = arith.constant 1 : index
    %c0_92 = arith.constant 0 : index
    %c0_93 = arith.constant 0 : index
    %221 = vector.load %arg5[%c1_91, %c0_92, %c0_93] : memref<2x1x64xf32, #tpu.memory_space<vmem>>, vector<1x1x64xf32>
    %222 = vector.shape_cast %221 : vector<1x1x64xf32> to vector<1x64xf32>
    %cst_94 = arith.constant dense<0.000000e+00> : vector<8xf32>
    %223 = vector.multi_reduction <add>, %218, %cst_94 [1] : vector<8x64xf32> to vector<8xf32>
    %224 = vector.shape_cast %223 : vector<8xf32> to vector<8x1xf32>
    %cst_95 = arith.constant 6.400000e+01 : f32
    %225 = vector.broadcast %cst_95 : f32 to vector<8x1xf32>
    %226 = arith.divf %224, %225 : vector<8x1xf32>
    %227 = vector.broadcast %226 : vector<8x1xf32> to vector<8x64xf32>
    %228 = arith.subf %218, %227 : vector<8x64xf32>
    %229 = arith.mulf %228, %228 : vector<8x64xf32>
    %cst_96 = arith.constant dense<0.000000e+00> : vector<8xf32>
    %230 = vector.multi_reduction <add>, %229, %cst_96 [1] : vector<8x64xf32> to vector<8xf32>
    %231 = vector.shape_cast %230 : vector<8xf32> to vector<8x1xf32>
    %cst_97 = arith.constant 6.400000e+01 : f32
    %232 = vector.broadcast %cst_97 : f32 to vector<8x1xf32>
    %233 = arith.divf %231, %232 : vector<8x1xf32>
    %cst_98 = arith.constant 9.99999997E-7 : f32
    %234 = vector.broadcast %cst_98 : f32 to vector<8x1xf32>
    %235 = arith.addf %233, %234 : vector<8x1xf32>
    %236 = math.rsqrt %235 : vector<8x1xf32>
    %237 = vector.broadcast %236 : vector<8x1xf32> to vector<8x64xf32>
    %238 = arith.mulf %228, %237 : vector<8x64xf32>
    %239 = vector.broadcast %220 : vector<1x64xf32> to vector<8x64xf32>
    %240 = arith.mulf %238, %239 : vector<8x64xf32>
    %241 = vector.broadcast %222 : vector<1x64xf32> to vector<8x64xf32>
    %242 = arith.addf %240, %241 : vector<8x64xf32>
    %c1_99 = arith.constant 1 : index
    %c0_100 = arith.constant 0 : index
    %c0_101 = arith.constant 0 : index
    %243 = vector.load %arg6[%c1_99, %c0_100, %c0_101] : memref<2x64x192xbf16, #tpu.memory_space<vmem>>, vector<1x64x192xbf16>
    %244 = vector.shape_cast %243 : vector<1x64x192xbf16> to vector<64x192xbf16>
    %c1_102 = arith.constant 1 : index
    %c0_103 = arith.constant 0 : index
    %c0_104 = arith.constant 0 : index
    %245 = vector.load %arg7[%c1_102, %c0_103, %c0_104] : memref<2x1x192xf32, #tpu.memory_space<vmem>>, vector<1x1x192xf32>
    %246 = vector.shape_cast %245 : vector<1x1x192xf32> to vector<1x192xf32>
    %247 = arith.truncf %242 : vector<8x64xf32> to vector<8x64xbf16>
    %cst_105 = arith.constant dense<0.000000e+00> : vector<8x192xf32>
    %248 = tpu.matmul %247, %244, %cst_105 {dimension_numbers = #tpu.dot_dimension_numbers<[1], [0], [0], [1], [0, 0, 1, 1], [], []>} : vector<8x64xbf16>, vector<64x192xbf16>, vector<8x192xf32> -> vector<8x192xf32>
    %249 = vector.broadcast %246 : vector<1x192xf32> to vector<8x192xf32>
    %250 = arith.addf %248, %249 : vector<8x192xf32>
    %251 = vector.extract_strided_slice %250 {offsets = [0, 0], sizes = [8, 16], strides = [1, 1]} : vector<8x192xf32> to vector<8x16xf32>
    %252 = vector.extract_strided_slice %250 {offsets = [0, 64], sizes = [8, 16], strides = [1, 1]} : vector<8x192xf32> to vector<8x16xf32>
    %253 = vector.extract_strided_slice %250 {offsets = [0, 128], sizes = [8, 16], strides = [1, 1]} : vector<8x192xf32> to vector<8x16xf32>
    %254 = arith.truncf %251 : vector<8x16xf32> to vector<8x16xbf16>
    %255 = arith.truncf %252 : vector<8x16xf32> to vector<8x16xbf16>
    "tpu.trace_start"() <{level = 10 : i32, message = "qd,kd->qk"}> : () -> ()
    %cst_106 = arith.constant dense<0.000000e+00> : vector<8x8xf32>
    %256 = tpu.matmul %254, %255, %cst_106 {dimension_numbers = #tpu.dot_dimension_numbers<[1], [1], [0], [0], [0, 0, 1, 0], [], []>} : vector<8x16xbf16>, vector<8x16xbf16>, vector<8x8xf32> -> vector<8x8xf32>
    "tpu.trace_stop"() : () -> ()
    %257 = vector.broadcast %11 : vector<1x8xf32> to vector<8x8xf32>
    %258 = arith.addf %256, %257 : vector<8x8xf32>
    %cst_107 = arith.constant dense<0xFF800000> : vector<8xf32>
    %259 = vector.multi_reduction <maximumf>, %258, %cst_107 [1] : vector<8x8xf32> to vector<8xf32>
    %260 = vector.shape_cast %259 : vector<8xf32> to vector<8x1xf32>
    %261 = vector.broadcast %260 : vector<8x1xf32> to vector<8x8xf32>
    %262 = arith.subf %258, %261 : vector<8x8xf32>
    %263 = math.exp %262 : vector<8x8xf32>
    %cst_108 = arith.constant dense<0.000000e+00> : vector<8xf32>
    %264 = vector.multi_reduction <add>, %263, %cst_108 [1] : vector<8x8xf32> to vector<8xf32>
    %265 = vector.shape_cast %264 : vector<8xf32> to vector<8x1xf32>
    %266 = tpu.reciprocal %265 {approx = true} : vector<8x1xf32> -> vector<8x1xf32>
    %267 = vector.broadcast %266 : vector<8x1xf32> to vector<8x8xf32>
    %268 = arith.mulf %263, %267 : vector<8x8xf32>
    %269 = arith.truncf %268 : vector<8x8xf32> to vector<8x8xbf16>
    %270 = arith.truncf %253 : vector<8x16xf32> to vector<8x16xbf16>
    %cst_109 = arith.constant dense<0.000000e+00> : vector<8x16xf32>
    %271 = tpu.matmul %269, %270, %cst_109 {dimension_numbers = #tpu.dot_dimension_numbers<[1], [0], [0], [1], [0, 0, 1, 1], [], []>} : vector<8x8xbf16>, vector<8x16xbf16>, vector<8x16xf32> -> vector<8x16xf32>
    %272 = vector.extract_strided_slice %250 {offsets = [0, 16], sizes = [8, 16], strides = [1, 1]} : vector<8x192xf32> to vector<8x16xf32>
    %273 = vector.extract_strided_slice %250 {offsets = [0, 80], sizes = [8, 16], strides = [1, 1]} : vector<8x192xf32> to vector<8x16xf32>
    %274 = vector.extract_strided_slice %250 {offsets = [0, 144], sizes = [8, 16], strides = [1, 1]} : vector<8x192xf32> to vector<8x16xf32>
    %275 = arith.truncf %272 : vector<8x16xf32> to vector<8x16xbf16>
    %276 = arith.truncf %273 : vector<8x16xf32> to vector<8x16xbf16>
    "tpu.trace_start"() <{level = 10 : i32, message = "qd,kd->qk"}> : () -> ()
    %cst_110 = arith.constant dense<0.000000e+00> : vector<8x8xf32>
    %277 = tpu.matmul %275, %276, %cst_110 {dimension_numbers = #tpu.dot_dimension_numbers<[1], [1], [0], [0], [0, 0, 1, 0], [], []>} : vector<8x16xbf16>, vector<8x16xbf16>, vector<8x8xf32> -> vector<8x8xf32>
    "tpu.trace_stop"() : () -> ()
    %278 = vector.broadcast %11 : vector<1x8xf32> to vector<8x8xf32>
    %279 = arith.addf %277, %278 : vector<8x8xf32>
    %cst_111 = arith.constant dense<0xFF800000> : vector<8xf32>
    %280 = vector.multi_reduction <maximumf>, %279, %cst_111 [1] : vector<8x8xf32> to vector<8xf32>
    %281 = vector.shape_cast %280 : vector<8xf32> to vector<8x1xf32>
    %282 = vector.broadcast %281 : vector<8x1xf32> to vector<8x8xf32>
    %283 = arith.subf %279, %282 : vector<8x8xf32>
    %284 = math.exp %283 : vector<8x8xf32>
    %cst_112 = arith.constant dense<0.000000e+00> : vector<8xf32>
    %285 = vector.multi_reduction <add>, %284, %cst_112 [1] : vector<8x8xf32> to vector<8xf32>
    %286 = vector.shape_cast %285 : vector<8xf32> to vector<8x1xf32>
    %287 = tpu.reciprocal %286 {approx = true} : vector<8x1xf32> -> vector<8x1xf32>
    %288 = vector.broadcast %287 : vector<8x1xf32> to vector<8x8xf32>
    %289 = arith.mulf %284, %288 : vector<8x8xf32>
    %290 = arith.truncf %289 : vector<8x8xf32> to vector<8x8xbf16>
    %291 = arith.truncf %274 : vector<8x16xf32> to vector<8x16xbf16>
    %cst_113 = arith.constant dense<0.000000e+00> : vector<8x16xf32>
    %292 = tpu.matmul %290, %291, %cst_113 {dimension_numbers = #tpu.dot_dimension_numbers<[1], [0], [0], [1], [0, 0, 1, 1], [], []>} : vector<8x8xbf16>, vector<8x16xbf16>, vector<8x16xf32> -> vector<8x16xf32>
    %293 = vector.extract_strided_slice %250 {offsets = [0, 32], sizes = [8, 16], strides = [1, 1]} : vector<8x192xf32> to vector<8x16xf32>
    %294 = vector.extract_strided_slice %250 {offsets = [0, 96], sizes = [8, 16], strides = [1, 1]} : vector<8x192xf32> to vector<8x16xf32>
    %295 = vector.extract_strided_slice %250 {offsets = [0, 160], sizes = [8, 16], strides = [1, 1]} : vector<8x192xf32> to vector<8x16xf32>
    %296 = arith.truncf %293 : vector<8x16xf32> to vector<8x16xbf16>
    %297 = arith.truncf %294 : vector<8x16xf32> to vector<8x16xbf16>
    "tpu.trace_start"() <{level = 10 : i32, message = "qd,kd->qk"}> : () -> ()
    %cst_114 = arith.constant dense<0.000000e+00> : vector<8x8xf32>
    %298 = tpu.matmul %296, %297, %cst_114 {dimension_numbers = #tpu.dot_dimension_numbers<[1], [1], [0], [0], [0, 0, 1, 0], [], []>} : vector<8x16xbf16>, vector<8x16xbf16>, vector<8x8xf32> -> vector<8x8xf32>
    "tpu.trace_stop"() : () -> ()
    %299 = vector.broadcast %11 : vector<1x8xf32> to vector<8x8xf32>
    %300 = arith.addf %298, %299 : vector<8x8xf32>
    %cst_115 = arith.constant dense<0xFF800000> : vector<8xf32>
    %301 = vector.multi_reduction <maximumf>, %300, %cst_115 [1] : vector<8x8xf32> to vector<8xf32>
    %302 = vector.shape_cast %301 : vector<8xf32> to vector<8x1xf32>
    %303 = vector.broadcast %302 : vector<8x1xf32> to vector<8x8xf32>
    %304 = arith.subf %300, %303 : vector<8x8xf32>
    %305 = math.exp %304 : vector<8x8xf32>
    %cst_116 = arith.constant dense<0.000000e+00> : vector<8xf32>
    %306 = vector.multi_reduction <add>, %305, %cst_116 [1] : vector<8x8xf32> to vector<8xf32>
    %307 = vector.shape_cast %306 : vector<8xf32> to vector<8x1xf32>
    %308 = tpu.reciprocal %307 {approx = true} : vector<8x1xf32> -> vector<8x1xf32>
    %309 = vector.broadcast %308 : vector<8x1xf32> to vector<8x8xf32>
    %310 = arith.mulf %305, %309 : vector<8x8xf32>
    %311 = arith.truncf %310 : vector<8x8xf32> to vector<8x8xbf16>
    %312 = arith.truncf %295 : vector<8x16xf32> to vector<8x16xbf16>
    %cst_117 = arith.constant dense<0.000000e+00> : vector<8x16xf32>
    %313 = tpu.matmul %311, %312, %cst_117 {dimension_numbers = #tpu.dot_dimension_numbers<[1], [0], [0], [1], [0, 0, 1, 1], [], []>} : vector<8x8xbf16>, vector<8x16xbf16>, vector<8x16xf32> -> vector<8x16xf32>
    %314 = vector.extract_strided_slice %250 {offsets = [0, 48], sizes = [8, 16], strides = [1, 1]} : vector<8x192xf32> to vector<8x16xf32>
    %315 = vector.extract_strided_slice %250 {offsets = [0, 112], sizes = [8, 16], strides = [1, 1]} : vector<8x192xf32> to vector<8x16xf32>
    %316 = vector.extract_strided_slice %250 {offsets = [0, 176], sizes = [8, 16], strides = [1, 1]} : vector<8x192xf32> to vector<8x16xf32>
    %317 = arith.truncf %314 : vector<8x16xf32> to vector<8x16xbf16>
    %318 = arith.truncf %315 : vector<8x16xf32> to vector<8x16xbf16>
    "tpu.trace_start"() <{level = 10 : i32, message = "qd,kd->qk"}> : () -> ()
    %cst_118 = arith.constant dense<0.000000e+00> : vector<8x8xf32>
    %319 = tpu.matmul %317, %318, %cst_118 {dimension_numbers = #tpu.dot_dimension_numbers<[1], [1], [0], [0], [0, 0, 1, 0], [], []>} : vector<8x16xbf16>, vector<8x16xbf16>, vector<8x8xf32> -> vector<8x8xf32>
    "tpu.trace_stop"() : () -> ()
    %320 = vector.broadcast %11 : vector<1x8xf32> to vector<8x8xf32>
    %321 = arith.addf %319, %320 : vector<8x8xf32>
    %cst_119 = arith.constant dense<0xFF800000> : vector<8xf32>
    %322 = vector.multi_reduction <maximumf>, %321, %cst_119 [1] : vector<8x8xf32> to vector<8xf32>
    %323 = vector.shape_cast %322 : vector<8xf32> to vector<8x1xf32>
    %324 = vector.broadcast %323 : vector<8x1xf32> to vector<8x8xf32>
    %325 = arith.subf %321, %324 : vector<8x8xf32>
    %326 = math.exp %325 : vector<8x8xf32>
    %cst_120 = arith.constant dense<0.000000e+00> : vector<8xf32>
    %327 = vector.multi_reduction <add>, %326, %cst_120 [1] : vector<8x8xf32> to vector<8xf32>
    %328 = vector.shape_cast %327 : vector<8xf32> to vector<8x1xf32>
    %329 = tpu.reciprocal %328 {approx = true} : vector<8x1xf32> -> vector<8x1xf32>
    %330 = vector.broadcast %329 : vector<8x1xf32> to vector<8x8xf32>
    %331 = arith.mulf %326, %330 : vector<8x8xf32>
    %332 = arith.truncf %331 : vector<8x8xf32> to vector<8x8xbf16>
    %333 = arith.truncf %316 : vector<8x16xf32> to vector<8x16xbf16>
    %cst_121 = arith.constant dense<0.000000e+00> : vector<8x16xf32>
    %334 = tpu.matmul %332, %333, %cst_121 {dimension_numbers = #tpu.dot_dimension_numbers<[1], [0], [0], [1], [0, 0, 1, 1], [], []>} : vector<8x8xbf16>, vector<8x16xbf16>, vector<8x16xf32> -> vector<8x16xf32>
    %335 = tpu.concatenate %271, %292, %313, %334 in 1 : vector<8x16xf32>, vector<8x16xf32>, vector<8x16xf32>, vector<8x16xf32> -> vector<8x64xf32>
    %c1_122 = arith.constant 1 : index
    %c0_123 = arith.constant 0 : index
    %c0_124 = arith.constant 0 : index
    %336 = vector.load %arg8[%c1_122, %c0_123, %c0_124] : memref<2x64x64xbf16, #tpu.memory_space<vmem>>, vector<1x64x64xbf16>
    %337 = vector.shape_cast %336 : vector<1x64x64xbf16> to vector<64x64xbf16>
    %c1_125 = arith.constant 1 : index
    %c0_126 = arith.constant 0 : index
    %c0_127 = arith.constant 0 : index
    %338 = vector.load %arg9[%c1_125, %c0_126, %c0_127] : memref<2x1x64xf32, #tpu.memory_space<vmem>>, vector<1x1x64xf32>
    %339 = vector.shape_cast %338 : vector<1x1x64xf32> to vector<1x64xf32>
    %340 = arith.truncf %335 : vector<8x64xf32> to vector<8x64xbf16>
    %cst_128 = arith.constant dense<0.000000e+00> : vector<8x64xf32>
    %341 = tpu.matmul %340, %337, %cst_128 {dimension_numbers = #tpu.dot_dimension_numbers<[1], [0], [0], [1], [0, 0, 1, 1], [], []>} : vector<8x64xbf16>, vector<64x64xbf16>, vector<8x64xf32> -> vector<8x64xf32>
    %342 = vector.broadcast %339 : vector<1x64xf32> to vector<8x64xf32>
    %343 = arith.addf %341, %342 : vector<8x64xf32>
    %344 = arith.addf %218, %343 : vector<8x64xf32>
    %c1_129 = arith.constant 1 : index
    %c0_130 = arith.constant 0 : index
    %c0_131 = arith.constant 0 : index
    %345 = vector.load %arg10[%c1_129, %c0_130, %c0_131] : memref<2x1x64xf32, #tpu.memory_space<vmem>>, vector<1x1x64xf32>
    %346 = vector.shape_cast %345 : vector<1x1x64xf32> to vector<1x64xf32>
    %c1_132 = arith.constant 1 : index
    %c0_133 = arith.constant 0 : index
    %c0_134 = arith.constant 0 : index
    %347 = vector.load %arg11[%c1_132, %c0_133, %c0_134] : memref<2x1x64xf32, #tpu.memory_space<vmem>>, vector<1x1x64xf32>
    %348 = vector.shape_cast %347 : vector<1x1x64xf32> to vector<1x64xf32>
    %cst_135 = arith.constant dense<0.000000e+00> : vector<8xf32>
    %349 = vector.multi_reduction <add>, %344, %cst_135 [1] : vector<8x64xf32> to vector<8xf32>
    %350 = vector.shape_cast %349 : vector<8xf32> to vector<8x1xf32>
    %cst_136 = arith.constant 6.400000e+01 : f32
    %351 = vector.broadcast %cst_136 : f32 to vector<8x1xf32>
    %352 = arith.divf %350, %351 : vector<8x1xf32>
    %353 = vector.broadcast %352 : vector<8x1xf32> to vector<8x64xf32>
    %354 = arith.subf %344, %353 : vector<8x64xf32>
    %355 = arith.mulf %354, %354 : vector<8x64xf32>
    %cst_137 = arith.constant dense<0.000000e+00> : vector<8xf32>
    %356 = vector.multi_reduction <add>, %355, %cst_137 [1] : vector<8x64xf32> to vector<8xf32>
    %357 = vector.shape_cast %356 : vector<8xf32> to vector<8x1xf32>
    %cst_138 = arith.constant 6.400000e+01 : f32
    %358 = vector.broadcast %cst_138 : f32 to vector<8x1xf32>
    %359 = arith.divf %357, %358 : vector<8x1xf32>
    %cst_139 = arith.constant 9.99999997E-7 : f32
    %360 = vector.broadcast %cst_139 : f32 to vector<8x1xf32>
    %361 = arith.addf %359, %360 : vector<8x1xf32>
    %362 = math.rsqrt %361 : vector<8x1xf32>
    %363 = vector.broadcast %362 : vector<8x1xf32> to vector<8x64xf32>
    %364 = arith.mulf %354, %363 : vector<8x64xf32>
    %365 = vector.broadcast %346 : vector<1x64xf32> to vector<8x64xf32>
    %366 = arith.mulf %364, %365 : vector<8x64xf32>
    %367 = vector.broadcast %348 : vector<1x64xf32> to vector<8x64xf32>
    %368 = arith.addf %366, %367 : vector<8x64xf32>
    %c1_140 = arith.constant 1 : index
    %c0_141 = arith.constant 0 : index
    %c0_142 = arith.constant 0 : index
    %369 = vector.load %arg12[%c1_140, %c0_141, %c0_142] : memref<2x64x256xbf16, #tpu.memory_space<vmem>>, vector<1x64x256xbf16>
    %370 = vector.shape_cast %369 : vector<1x64x256xbf16> to vector<64x256xbf16>
    %c1_143 = arith.constant 1 : index
    %c0_144 = arith.constant 0 : index
    %c0_145 = arith.constant 0 : index
    %371 = vector.load %arg13[%c1_143, %c0_144, %c0_145] : memref<2x1x256xf32, #tpu.memory_space<vmem>>, vector<1x1x256xf32>
    %372 = vector.shape_cast %371 : vector<1x1x256xf32> to vector<1x256xf32>
    %373 = arith.truncf %368 : vector<8x64xf32> to vector<8x64xbf16>
    %cst_146 = arith.constant dense<0.000000e+00> : vector<8x256xf32>
    %374 = tpu.matmul %373, %370, %cst_146 {dimension_numbers = #tpu.dot_dimension_numbers<[1], [0], [0], [1], [0, 0, 1, 1], [], []>} : vector<8x64xbf16>, vector<64x256xbf16>, vector<8x256xf32> -> vector<8x256xf32>
    %375 = vector.broadcast %372 : vector<1x256xf32> to vector<8x256xf32>
    %376 = arith.addf %374, %375 : vector<8x256xf32>
    %cst_147 = arith.constant 5.000000e-01 : f32
    %377 = vector.broadcast %cst_147 : f32 to vector<8x256xf32>
    %378 = arith.mulf %377, %376 : vector<8x256xf32>
    %cst_148 = arith.constant 0.707106769 : f32
    %379 = vector.broadcast %cst_148 : f32 to vector<8x256xf32>
    %380 = arith.mulf %376, %379 : vector<8x256xf32>
    %381 = math.absf %380 : vector<8x256xf32>
    %cst_149 = arith.constant 0.327591091 : f32
    %382 = vector.broadcast %cst_149 : f32 to vector<8x256xf32>
    %383 = arith.mulf %382, %381 : vector<8x256xf32>
    %cst_150 = arith.constant 1.000000e+00 : f32
    %384 = vector.broadcast %cst_150 : f32 to vector<8x256xf32>
    %385 = arith.addf %384, %383 : vector<8x256xf32>
    %cst_151 = arith.constant 1.000000e+00 : f32
    %386 = vector.broadcast %cst_151 : f32 to vector<8x256xf32>
    %387 = arith.divf %386, %385 : vector<8x256xf32>
    %cst_152 = arith.constant 1.06140542 : f32
    %388 = vector.broadcast %cst_152 : f32 to vector<8x256xf32>
    %389 = arith.mulf %388, %387 : vector<8x256xf32>
    %cst_153 = arith.constant -1.45315206 : f32
    %390 = vector.broadcast %cst_153 : f32 to vector<8x256xf32>
    %391 = arith.addf %389, %390 : vector<8x256xf32>
    %392 = arith.mulf %391, %387 : vector<8x256xf32>
    %cst_154 = arith.constant 1.42141378 : f32
    %393 = vector.broadcast %cst_154 : f32 to vector<8x256xf32>
    %394 = arith.addf %392, %393 : vector<8x256xf32>
    %395 = arith.mulf %394, %387 : vector<8x256xf32>
    %cst_155 = arith.constant -0.284496725 : f32
    %396 = vector.broadcast %cst_155 : f32 to vector<8x256xf32>
    %397 = arith.addf %395, %396 : vector<8x256xf32>
    %398 = arith.mulf %397, %387 : vector<8x256xf32>
    %cst_156 = arith.constant 0.254829586 : f32
    %399 = vector.broadcast %cst_156 : f32 to vector<8x256xf32>
    %400 = arith.addf %398, %399 : vector<8x256xf32>
    %401 = arith.mulf %400, %387 : vector<8x256xf32>
    %cst_157 = arith.constant 0.000000e+00 : f32
    %402 = vector.broadcast %cst_157 : f32 to vector<8x256xf32>
    %403 = arith.subf %402, %381 : vector<8x256xf32>
    %404 = arith.mulf %403, %381 : vector<8x256xf32>
    %405 = math.exp %404 : vector<8x256xf32>
    %406 = arith.mulf %401, %405 : vector<8x256xf32>
    %cst_158 = arith.constant 1.000000e+00 : f32
    %407 = vector.broadcast %cst_158 : f32 to vector<8x256xf32>
    %408 = arith.subf %407, %406 : vector<8x256xf32>
    %cst_159 = arith.constant 0.000000e+00 : f32
    %409 = vector.broadcast %cst_159 : f32 to vector<8x256xf32>
    %410 = arith.cmpf oge, %380, %409 : vector<8x256xf32>
    %cst_160 = arith.constant 0.000000e+00 : f32
    %411 = vector.broadcast %cst_160 : f32 to vector<8x256xf32>
    %412 = arith.subf %411, %408 : vector<8x256xf32>
    %413 = arith.select %410, %408, %412 : vector<8x256xi1>, vector<8x256xf32>
    %cst_161 = arith.constant 1.000000e+00 : f32
    %414 = vector.broadcast %cst_161 : f32 to vector<8x256xf32>
    %415 = arith.addf %414, %413 : vector<8x256xf32>
    %416 = arith.mulf %378, %415 : vector<8x256xf32>
    %c1_162 = arith.constant 1 : index
    %c0_163 = arith.constant 0 : index
    %c0_164 = arith.constant 0 : index
    %417 = vector.load %arg14[%c1_162, %c0_163, %c0_164] : memref<2x256x64xbf16, #tpu.memory_space<vmem>>, vector<1x256x64xbf16>
    %418 = vector.shape_cast %417 : vector<1x256x64xbf16> to vector<256x64xbf16>
    %c1_165 = arith.constant 1 : index
    %c0_166 = arith.constant 0 : index
    %c0_167 = arith.constant 0 : index
    %419 = vector.load %arg15[%c1_165, %c0_166, %c0_167] : memref<2x1x64xf32, #tpu.memory_space<vmem>>, vector<1x1x64xf32>
    %420 = vector.shape_cast %419 : vector<1x1x64xf32> to vector<1x64xf32>
    %421 = arith.truncf %416 : vector<8x256xf32> to vector<8x256xbf16>
    %cst_168 = arith.constant dense<0.000000e+00> : vector<8x64xf32>
    %422 = tpu.matmul %421, %418, %cst_168 {dimension_numbers = #tpu.dot_dimension_numbers<[1], [0], [0], [1], [0, 0, 1, 1], [], []>} : vector<8x256xbf16>, vector<256x64xbf16>, vector<8x64xf32> -> vector<8x64xf32>
    %423 = vector.broadcast %420 : vector<1x64xf32> to vector<8x64xf32>
    %424 = arith.addf %422, %423 : vector<8x64xf32>
    %425 = arith.addf %344, %424 : vector<8x64xf32>
    %c0_169 = arith.constant 0 : index
    %c0_170 = arith.constant 0 : index
    %426 = vector.load %arg16[%c0_169, %c0_170] : memref<1x64xf32, #tpu.memory_space<vmem>>, vector<1x64xf32>
    %c0_171 = arith.constant 0 : index
    %c0_172 = arith.constant 0 : index
    %427 = vector.load %arg17[%c0_171, %c0_172] : memref<1x64xf32, #tpu.memory_space<vmem>>, vector<1x64xf32>
    %cst_173 = arith.constant dense<0.000000e+00> : vector<8xf32>
    %428 = vector.multi_reduction <add>, %425, %cst_173 [1] : vector<8x64xf32> to vector<8xf32>
    %429 = vector.shape_cast %428 : vector<8xf32> to vector<8x1xf32>
    %cst_174 = arith.constant 6.400000e+01 : f32
    %430 = vector.broadcast %cst_174 : f32 to vector<8x1xf32>
    %431 = arith.divf %429, %430 : vector<8x1xf32>
    %432 = vector.broadcast %431 : vector<8x1xf32> to vector<8x64xf32>
    %433 = arith.subf %425, %432 : vector<8x64xf32>
    %434 = arith.mulf %433, %433 : vector<8x64xf32>
    %cst_175 = arith.constant dense<0.000000e+00> : vector<8xf32>
    %435 = vector.multi_reduction <add>, %434, %cst_175 [1] : vector<8x64xf32> to vector<8xf32>
    %436 = vector.shape_cast %435 : vector<8xf32> to vector<8x1xf32>
    %cst_176 = arith.constant 6.400000e+01 : f32
    %437 = vector.broadcast %cst_176 : f32 to vector<8x1xf32>
    %438 = arith.divf %436, %437 : vector<8x1xf32>
    %cst_177 = arith.constant 9.99999997E-7 : f32
    %439 = vector.broadcast %cst_177 : f32 to vector<8x1xf32>
    %440 = arith.addf %438, %439 : vector<8x1xf32>
    %441 = math.rsqrt %440 : vector<8x1xf32>
    %442 = vector.broadcast %441 : vector<8x1xf32> to vector<8x64xf32>
    %443 = arith.mulf %433, %442 : vector<8x64xf32>
    %444 = vector.broadcast %426 : vector<1x64xf32> to vector<8x64xf32>
    %445 = arith.mulf %443, %444 : vector<8x64xf32>
    %446 = vector.broadcast %427 : vector<1x64xf32> to vector<8x64xf32>
    %447 = arith.addf %445, %446 : vector<8x64xf32>
    %c0_178 = arith.constant 0 : index
    %c0_179 = arith.constant 0 : index
    %448 = vector.load %arg18[%c0_178, %c0_179] : memref<64x128xbf16, #tpu.memory_space<vmem>>, vector<64x128xbf16>
    %c0_180 = arith.constant 0 : index
    %c0_181 = arith.constant 0 : index
    %449 = vector.load %arg19[%c0_180, %c0_181] : memref<1x128xf32, #tpu.memory_space<vmem>>, vector<1x128xf32>
    %450 = arith.truncf %447 : vector<8x64xf32> to vector<8x64xbf16>
    %cst_182 = arith.constant dense<0.000000e+00> : vector<8x128xf32>
    %451 = tpu.matmul %450, %448, %cst_182 {dimension_numbers = #tpu.dot_dimension_numbers<[1], [0], [0], [1], [0, 0, 1, 1], [], []>} : vector<8x64xbf16>, vector<64x128xbf16>, vector<8x128xf32> -> vector<8x128xf32>
    %452 = vector.broadcast %449 : vector<1x128xf32> to vector<8x128xf32>
    %453 = arith.addf %451, %452 : vector<8x128xf32>
    %c0_183 = arith.constant 0 : index
    %c0_184 = arith.constant 0 : index
    %c0_185 = arith.constant 0 : index
    %454 = vector.load %arg20[%c0_183, %c0_184, %c0_185] : memref<1x8x128xf32, #tpu.memory_space<vmem>>, vector<1x8x128xf32>
    %455 = vector.shape_cast %454 : vector<1x8x128xf32> to vector<8x128xf32>
    %456 = vector.shape_cast %453 : vector<8x128xf32> to vector<1x8x128xf32>
    tpu.vector_store %arg20[%c0_183, %c0_184, %c0_185], %456 {strides = array<i32>} : memref<1x8x128xf32, #tpu.memory_space<vmem>>, vector<1x8x128xf32>,
    return
  }
  func.func @transform_0(%arg0: i32) -> (i32, i32, i32) {
    %c0_i32 = arith.constant 0 : i32
    %c0_i32_0 = arith.constant 0 : i32
    %c0_i32_1 = arith.constant 0 : i32
    return %arg0, %c0_i32, %c0_i32_0 : i32, i32, i32
  }
  func.func @transform_1(%arg0: i32) -> (i32, i32) {
    %c0_i32 = arith.constant 0 : i32
    %c0_i32_0 = arith.constant 0 : i32
    %c0_i32_1 = arith.constant 0 : i32
    return %c0_i32, %c0_i32_0 : i32, i32
  }
  func.func @transform_2(%arg0: i32) -> (i32, i32) {
    %c0_i32 = arith.constant 0 : i32
    %c0_i32_0 = arith.constant 0 : i32
    %c0_i32_1 = arith.constant 0 : i32
    return %c0_i32, %c0_i32_0 : i32, i32
  }
  func.func @transform_3(%arg0: i32) -> (i32, i32, i32) {
    %c0_i32 = arith.constant 0 : i32
    %c0_i32_0 = arith.constant 0 : i32
    %c0_i32_1 = arith.constant 0 : i32
    %c0_i32_2 = arith.constant 0 : i32
    return %c0_i32, %c0_i32_0, %c0_i32_1 : i32, i32, i32
  }
  func.func @transform_4(%arg0: i32) -> (i32, i32, i32) {
    %c0_i32 = arith.constant 0 : i32
    %c0_i32_0 = arith.constant 0 : i32
    %c0_i32_1 = arith.constant 0 : i32
    %c0_i32_2 = arith.constant 0 : i32
    return %c0_i32, %c0_i32_0, %c0_i32_1 : i32, i32, i32
  }
  func.func @transform_5(%arg0: i32) -> (i32, i32, i32) {
    %c0_i32 = arith.constant 0 : i32
    %c0_i32_0 = arith.constant 0 : i32
    %c0_i32_1 = arith.constant 0 : i32
    %c0_i32_2 = arith.constant 0 : i32
    return %c0_i32, %c0_i32_0, %c0_i32_1 : i32, i32, i32
  }
  func.func @transform_6(%arg0: i32) -> (i32, i32, i32) {
    %c0_i32 = arith.constant 0 : i32
    %c0_i32_0 = arith.constant 0 : i32
    %c0_i32_1 = arith.constant 0 : i32
    %c0_i32_2 = arith.constant 0 : i32
    return %c0_i32, %c0_i32_0, %c0_i32_1 : i32, i32, i32
  }
  func.func @transform_7(%arg0: i32) -> (i32, i32, i32) {
    %c0_i32 = arith.constant 0 : i32
    %c0_i32_0 = arith.constant 0 : i32
    %c0_i32_1 = arith.constant 0 : i32
    %c0_i32_2 = arith.constant 0 : i32
    return %c0_i32, %c0_i32_0, %c0_i32_1 : i32, i32, i32
  }
  func.func @transform_8(%arg0: i32) -> (i32, i32, i32) {
    %c0_i32 = arith.constant 0 : i32
    %c0_i32_0 = arith.constant 0 : i32
    %c0_i32_1 = arith.constant 0 : i32
    %c0_i32_2 = arith.constant 0 : i32
    return %c0_i32, %c0_i32_0, %c0_i32_1 : i32, i32, i32
  }
  func.func @transform_9(%arg0: i32) -> (i32, i32, i32) {
    %c0_i32 = arith.constant 0 : i32
    %c0_i32_0 = arith.constant 0 : i32
    %c0_i32_1 = arith.constant 0 : i32
    %c0_i32_2 = arith.constant 0 : i32
    return %c0_i32, %c0_i32_0, %c0_i32_1 : i32, i32, i32
  }
  func.func @transform_10(%arg0: i32) -> (i32, i32, i32) {
    %c0_i32 = arith.constant 0 : i32
    %c0_i32_0 = arith.constant 0 : i32
    %c0_i32_1 = arith.constant 0 : i32
    %c0_i32_2 = arith.constant 0 : i32
    return %c0_i32, %c0_i32_0, %c0_i32_1 : i32, i32, i32
  }
  func.func @transform_11(%arg0: i32) -> (i32, i32, i32) {
    %c0_i32 = arith.constant 0 : i32
    %c0_i32_0 = arith.constant 0 : i32
    %c0_i32_1 = arith.constant 0 : i32
    %c0_i32_2 = arith.constant 0 : i32
    return %c0_i32, %c0_i32_0, %c0_i32_1 : i32, i32, i32
  }
  func.func @transform_12(%arg0: i32) -> (i32, i32, i32) {
    %c0_i32 = arith.constant 0 : i32
    %c0_i32_0 = arith.constant 0 : i32
    %c0_i32_1 = arith.constant 0 : i32
    %c0_i32_2 = arith.constant 0 : i32
    return %c0_i32, %c0_i32_0, %c0_i32_1 : i32, i32, i32
  }
  func.func @transform_13(%arg0: i32) -> (i32, i32, i32) {
    %c0_i32 = arith.constant 0 : i32
    %c0_i32_0 = arith.constant 0 : i32
    %c0_i32_1 = arith.constant 0 : i32
    %c0_i32_2 = arith.constant 0 : i32
    return %c0_i32, %c0_i32_0, %c0_i32_1 : i32, i32, i32
  }
  func.func @transform_14(%arg0: i32) -> (i32, i32, i32) {
    %c0_i32 = arith.constant 0 : i32
    %c0_i32_0 = arith.constant 0 : i32
    %c0_i32_1 = arith.constant 0 : i32
    %c0_i32_2 = arith.constant 0 : i32
    return %c0_i32, %c0_i32_0, %c0_i32_1 : i32, i32, i32
  }
  func.func @transform_15(%arg0: i32) -> (i32, i32) {
    %c0_i32 = arith.constant 0 : i32
    %c0_i32_0 = arith.constant 0 : i32
    %c0_i32_1 = arith.constant 0 : i32
    return %c0_i32, %c0_i32_0 : i32, i32
  }
  func.func @transform_16(%arg0: i32) -> (i32, i32) {
    %c0_i32 = arith.constant 0 : i32
    %c0_i32_0 = arith.constant 0 : i32
    %c0_i32_1 = arith.constant 0 : i32
    return %c0_i32, %c0_i32_0 : i32, i32
  }
  func.func @transform_17(%arg0: i32) -> (i32, i32) {
    %c0_i32 = arith.constant 0 : i32
    %c0_i32_0 = arith.constant 0 : i32
    %c0_i32_1 = arith.constant 0 : i32
    return %c0_i32, %c0_i32_0 : i32, i32
  }
  func.func @transform_18(%arg0: i32) -> (i32, i32) {
    %c0_i32 = arith.constant 0 : i32
    %c0_i32_0 = arith.constant 0 : i32
    %c0_i32_1 = arith.constant 0 : i32
    return %c0_i32, %c0_i32_0 : i32, i32
  }
  func.func @transform_19(%arg0: i32) -> (i32, i32, i32) {
    %c0_i32 = arith.constant 0 : i32
    %c0_i32_0 = arith.constant 0 : i32
    %c0_i32_1 = arith.constant 0 : i32
    return %arg0, %c0_i32, %c0_i32_0 : i32, i32, i32
  }
}

</mosaic_0001>

<bundles_post_ra>
// kernel: vit_forward.1
= control target key start
LH: loop header
LB: loop body
LE: loop exit
PB: predicated region body
PF: predicated region fallthrough
CT: control target
= control target key end

     0   :  { %s4957_s0 = inlined_call_operand.vmem [shape: bf16[2,8,768], index: 0, kind: input, shape index: {}]   ;;  %s4958_s1 = inlined_call_operand.vmem [shape: bf16[768,64], index: 1, kind: input, shape index: {}]   ;;  %s4959_s2 = inlined_call_operand.vmem [shape: f32[8,64], index: 2, kind: input, shape index: {}]   ;;  %s4960_s3 = inlined_call_operand.vmem [shape: f32[2,1,64], index: 3, kind: input, shape index: {}]   ;;  %s4961_s4 = inlined_call_operand.vmem [shape: f32[2,1,64], index: 4, kind: input, shape index: {}]   ;;  %s4962_s5 = inlined_call_operand.vmem [shape: bf16[2,64,192], index: 5, kind: input, shape index: {}]   ;;  %s4963_s6 = inlined_call_operand.vmem [shape: f32[2,1,192], index: 6, kind: input, shape index: {}]   ;;  %s4964_s7 = inlined_call_operand.vmem [shape: bf16[2,64,64], index: 7, kind: input, shape index: {}]   ;;  %s4965_s8 = inlined_call_operand.vmem [shape: f32[2,1,64], index: 8, kind: input, shape index: {}]   ;;  %s4966_s9 = inlined_call_operand.vmem [shape: f32[2,1,64], index: 9, kind: input, shape index: {}]   ;;  %s4967_s10 = inlined_call_operand.vmem [shape: f32[2,1,64], index: 10, kind: input, shape index: {}]   ;;  %s4968_s11 = inlined_call_operand.vmem [shape: bf16[2,64,256], index: 11, kind: input, shape index: {}]   ;;  %s4969_s12 = inlined_call_operand.vmem [shape: f32[2,1,256], index: 12, kind: input, shape index: {}]   ;;  %s4970_s13 = inlined_call_operand.vmem [shape: bf16[2,256,64], index: 13, kind: input, shape index: {}]   ;;  %s4971_s14 = inlined_call_operand.vmem [shape: f32[2,1,64], index: 14, kind: input, shape index: {}]   ;;  %s4972_s15 = inlined_call_operand.vmem [shape: f32[1,64], index: 15, kind: input, shape index: {}]   ;;  %s4973_s16 = inlined_call_operand.vmem [shape: f32[1,64], index: 16, kind: input, shape index: {}]   ;;  %s4974_s17 = inlined_call_operand.vmem [shape: bf16[64,128], index: 17, kind: input, shape index: {}]   ;;  %s4975_s18 = inlined_call_operand.vmem [shape: f32[1,128], index: 18, kind: input, shape index: {}]   ;;  %s4976_s19 = inlined_call_operand.vmem [shape: f32[2,8,128], index: 19, kind: output, shape index: {}]  }
   0x1   :  { %4990 = sst [smem:[#allocation2_spill]] %s4957_s0  ;;  %s4271_s0 = smov 0  }
   0x2   :  { %4991 = sst [smem:[#allocation3_spill]] %s4958_s1 }
   0x3   :  { %4992 = sst [smem:[#allocation4_spill]] %s4959_s2 }
   0x4   :  { %4993 = sst [smem:[#allocation5_spill]] %s4960_s3 }
   0x5 LB: > { %s3398_s30 = sadd.s32 4294967295, %s4158_s0   ;;  %p3402_p0 = scmp.ge.s32.totalorder %s4158_s0, 1  ;;  %s4158_s0 = sphi %s4271_s0, %s29_s0  }
   0x6   : > { %p537_p1 = scmp.lt.s32.totalorder %s4158_s0, 3 }
   0x8   : > { %p538_p2 = pnand %p3402_p0, %p537_p1 }
   0x9   : > { %s4994_s1 = sld [smem:[#allocation3_spill]] (!%p538_p2)  ;;  %p592_p3 = scmp.lt.s32.totalorder (!%p538_p2), %s3398_s30, 1 }
   0xa   : > { %541 = sbr.rel (%p538_p2) target bundleno = 6193 (0x1831), region = 96  ;;  %s4995_s21 = sld [smem:[#allocation2_spill]] (!%p538_p2) }
   0xb   : > { %s4996_s27 = sld [smem:[#allocation4_spill]] (!%p538_p2)  ;;  %s4981_s28 = smov (!%p538_p2), 96  }
   0xc   : > { %s4997_s25 = sld [smem:[#allocation5_spill]] (!%p538_p2)  ;;  %s4166_s29 = smov (!%p538_p2), 48  }
   0xd   : > { %s4985_s20 = smov (!%p538_p2), 112   ;;  %s4987_s23 = smov (!%p538_p2), 16  }
   0xe   : > { %s4979_s24 = smov (!%p538_p2), 80   ;;  %s5000_s26 = smov (!%p538_p2), 112  }
   0xf   : > { %v3948_v0 = vld [vmem:[%s4994_s1 + $0x78] sm:$0xff]   ;;  %v3952_v4 = vld [vmem:[%s4994_s1 + $0x70] sm:$0xff]   ;;  %v3956_v8 = vld [vmem:[%s4994_s1 + $0x68] sm:$0xff]   ;;  %s5005_s30 = smov (!%p592_p3, %s3398_s30), 1  ;;  %vm1137_vm0 = vcmask 523264   ;;  %vm4162_vm1 = vmmov 0  }
  0x10   : > { %v3949_v1 = vld [vmem:[%s4994_s1 + $0x38] sm:$0xff]   ;;  %3639 = vmatprep.subr.bf16.mxu0 %v3948_v0  ;;  %v3953_v5 = vld [vmem:[%s4994_s1 + $0x30] sm:$0xff]   ;;  %v3957_v9 = vld [vmem:[%s4994_s1 + $0x28] sm:$0xff]   ;;  %s3928_s22 = smul.u32 24, %s5005_s30  ;;  %vm1275_vm2 = vcmask 130048   ;;  %vm1339_vm3 = vcmask 1043456  }
  0x11   : > { %v3950_v2 = vld [vmem:[%s4994_s1 + $0xf8] sm:$0xff]   ;;  %3640 = vmatpush3.bf16.msra.mxu0 %v3949_v1  ;;  %v3954_v6 = vld [vmem:[%s4994_s1 + $0xf0] sm:$0xff]   ;;  %v3958_v10 = vld [vmem:[%s4994_s1 + $0xe8] sm:$0xff]   ;;  %vm1322_vm5 = vcmask 64512   ;;  %vm1727_vm6 = vcmask 261120   ;;  %vm1729_vm7 = vcmask 392192  }
  0x12   : > { %v3951_v3 = vld [vmem:[%s4994_s1 + $0xb8] sm:$0xff]   ;;  %3661 = vmatprep.subr.bf16.mxu1 %v3950_v2  ;;  %3641 = vmatprep.subr.bf16.mxu0 %v3952_v4  ;;  %v3955_v7 = vld [vmem:[%s4994_s1 + $0xb0] sm:$0xff]   ;;  %v3959_v11 = vld [vmem:[%s4994_s1 + $0xa8] sm:$0xff]   ;;  %s4376_s2 = scalar_lea.vmem %s4995_s21, %s3928_s22  ;;  %s4983_s21 = smov 32  }
  0x13   : > { %3662 = vmatpush3.bf16.msra.mxu1 %v3951_v3  ;;  %v3960_v12 = vld [vmem:[%s4994_s1 + $0x60] sm:$0xff]   ;;  %v3964_v16 = vld [vmem:[%s4994_s1 + $0x58] sm:$0xff]   ;;  %v3968_v20 = vld [vmem:[%s4994_s1 + $0x50] sm:$0xff]   ;;  %s5001_s22 = smov 32   ;;  %s5003_s3 = smov 80  }
  0x14   : > { %3663 = vmatprep.subr.bf16.mxu1 %v3954_v6  ;;  %v3961_v13 = vld [vmem:[%s4994_s1 + $0x20] sm:$0xff]   ;;  %v3965_v17 = vld [vmem:[%s4994_s1 + $0x18] sm:$0xff]   ;;  %v3969_v21 = vld [vmem:[%s4994_s1 + $0x10] sm:$0xff]  }
  0x15   : > { %3642 = vmatpush3.bf16.msra.mxu0 %v3953_v5  ;;  %v3962_v14 = vld [vmem:[%s4994_s1 + $0xe0] sm:$0xff]   ;;  %v3966_v18 = vld [vmem:[%s4994_s1 + $0xd8] sm:$0xff]   ;;  %v3970_v22 = vld [vmem:[%s4994_s1 + $0xd0] sm:$0xff]  }
  0x16   : > { %3643 = vmatprep.subr.bf16.mxu0 %v3956_v8  ;;  %v3963_v15 = vld [vmem:[%s4994_s1 + $0xa0] sm:$0xff]   ;;  %v3967_v19 = vld [vmem:[%s4994_s1 + $0x98] sm:$0xff]   ;;  %v3971_v23 = vld [vmem:[%s4994_s1 + $0x90] sm:$0xff]  }
  0x17   : > { %3664 = vmatpush3.bf16.msra.mxu1 %v3955_v7  ;;  %v3972_v24 = vld [vmem:[%s4994_s1 + $0x48] sm:$0xff]   ;;  %v3976_v28 = vld [vmem:[%s4994_s1 + $0x40] sm:$0xff]   ;;  %v3982_v35 = vld [vmem:[%s4994_s1 + $0x178] sm:$0xff]  }
  0x18   : > { %3665 = vmatprep.subr.bf16.mxu1 %v3958_v10  ;;  %v3973_v25 = vld [vmem:[%s4994_s1 + $0x8] sm:$0xff]   ;;  %v3977_v29 = vld [vmem:[%s4994_s1] sm:$0xff]   ;;  %v3985_v39 = vld [vmem:[%s4994_s1 + $0x138] sm:$0xff]  }
  0x19   : > { %3644 = vmatpush3.bf16.msra.mxu0 %v3957_v9  ;;  %v3974_v26 = vld [vmem:[%s4994_s1 + $0xc8] sm:$0xff]   ;;  %v3978_v30 = vld [vmem:[%s4994_s1 + $0xc0] sm:$0xff]   ;;  %v3986_v40 = vld [vmem:[%s4994_s1 + $0x170] sm:$0xff]  }
  0x1a   : > { %3645 = vmatprep.subr.bf16.mxu0 %v3960_v12  ;;  %v3975_v27 = vld [vmem:[%s4994_s1 + $0x88] sm:$0xff]   ;;  %v602_v31 = vld [vmem:[%s4376_s2] sm:$0xff]  ;;  %v3987_v41 = vld [vmem:[%s4994_s1 + $0x130] sm:$0xff]  }
  0x1b   : > { %3666 = vmatpush3.bf16.msra.mxu1 %v3959_v11  ;;  %v3405_v32 = vcombine.low %v602_v31, %v602_v31  ;;  %v3406_v33 = vcombine.high %v602_v31, %v602_v31  ;;  %v3981_v34 = vld [vmem:[%s4994_s1 + $0x80] sm:$0xff]   ;;  %v603_v36 = vld [vmem:[%s4376_s2 + $0x8] sm:$0xff]  ;;  %v3992_v46 = vld [vmem:[%s4994_s1 + $0x158] sm:$0xff]  }
  0x1c   : > { %3667 = vmatprep.subr.bf16.mxu1 %v3962_v14  ;;  %v3407_v37 = vcombine.low %v603_v36, %v603_v36  ;;  %v3408_v38 = vcombine.high %v603_v36, %v603_v36  ;;  %v3988_v42 = vld [vmem:[%s4994_s1 + $0x168] sm:$0xff]   ;;  %v3990_v44 = vld [vmem:[%s4994_s1 + $0x160] sm:$0xff]   ;;  %v3993_v47 = vld [vmem:[%s4994_s1 + $0x118] sm:$0xff]  }
  0x1d   : > { %3646 = vmatpush3.bf16.msra.mxu0 %v3961_v13  ;;  %1043 = vmatprep.mubr.bf16.mxu0 %v3406_v33  ;;  %v3989_v43 = vld [vmem:[%s4994_s1 + $0x128] sm:$0xff]   ;;  %v3991_v45 = vld [vmem:[%s4994_s1 + $0x120] sm:$0xff]   ;;  %v3994_v48 = vld [vmem:[%s4994_s1 + $0x150] sm:$0xff]  }
  0x1e   : > { %3647 = vmatprep.subr.bf16.mxu0 %v3964_v16  ;;  %1083 = vmatprep.mubr.bf16.mxu1 %v3408_v38  ;;  %v604_v49 = vld [vmem:[%s4376_s2 + $0x10] sm:$0xff]  ;;  %v3996_v52 = vld [vmem:[%s4994_s1 + $0x148] sm:$0xff]   ;;  %v3998_v54 = vld [vmem:[%s4994_s1 + $0x140] sm:$0xff]   ;;  %s5002_s2 = smov 96  }
  0x1f   : > { %3668 = vmatpush3.bf16.msra.mxu1 %v3963_v15  ;;  %v3410_v50 = vcombine.high %v604_v49, %v604_v49  ;;  %v3995_v51 = vld [vmem:[%s4994_s1 + $0x110] sm:$0xff]   ;;  %v3997_v53 = vld [vmem:[%s4994_s1 + $0x108] sm:$0xff]   ;;  %v3999_v55 = vld [vmem:[%s4994_s1 + $0x100] sm:$0xff]   ;;  %v3409_v56 = vcombine.low %v604_v49, %v604_v49 }
  0x20   : > { %3669 = vmatprep.subr.bf16.mxu1 %v3966_v18  ;;  %v701_v2 = vld [vmem:[%s4996_s27] sm:$0xff]  ;;  %v4004_v18 = vld [vmem:[%s4962_s5 + $0x34] ss:$8 sps:$4 sm:$0xff]   ;;  %s4989_s27 = smov 64  }
  0x21   : > { %3648 = vmatpush3.bf16.msra.mxu0 %v3965_v17  ;;  %v3459_v31 = vld [vmem:[%s4997_s25] ss:$0 sm:$0xff] }
  0x22   : > { %3649 = vmatprep.subr.bf16.mxu0 %v3968_v20  ;;  %v4007_v20 = vld [vmem:[%s4962_s5 + $0x24] ss:$8 sps:$4 sm:$0xff]   ;;  %v3460_v33 = vld [vmem:[%s4961_s4] ss:$0 sm:$0xff] }
  0x23   : > { %3670 = vmatpush3.bf16.msra.mxu1 %v3967_v19  ;;  %v4002_v19 = vld [vmem:[%s4962_s5 + $0x30] ss:$8 sps:$4 sm:$0xff]  }
  0x24   : > { %3671 = vmatprep.subr.bf16.mxu1 %v3970_v22  ;;  %v4010_v22 = vld [vmem:[%s4962_s5 + $0x14] ss:$8 sps:$4 sm:$0xff]  }
  0x25   : > { %3650 = vmatpush3.bf16.msra.mxu0 %v3969_v21  ;;  %v4005_v21 = vld [vmem:[%s4962_s5 + $0x20] ss:$8 sps:$4 sm:$0xff]  }
  0x26   : > { %3651 = vmatprep.subr.bf16.mxu0 %v3972_v24  ;;  %v4013_v24 = vld [vmem:[%s4962_s5 + $0x4] ss:$8 sps:$4 sm:$0xff]  }
  0x27   : > { %3672 = vmatpush3.bf16.msra.mxu1 %v3971_v23  ;;  %v4008_v23 = vld [vmem:[%s4962_s5 + $0x10] ss:$8 sps:$4 sm:$0xff]  }
  0x28   : > { %3673 = vmatprep.subr.bf16.mxu1 %v3974_v26  ;;  %v4160_v26 = vmov 0  }
  0x29   : > { %3652 = vmatpush3.bf16.msra.mxu0 %v3973_v25  ;;  %v4011_v25 = vld [vmem:[%s4962_s5] ss:$8 sps:$4 sm:$0xff]  }
  0x2a   : > { %3653 = vmatprep.subr.bf16.mxu0 %v3976_v28 }
  0x2b   : > { %3674 = vmatpush3.bf16.msra.mxu1 %v3975_v27 }
  0x2c   : > { %3675 = vmatprep.subr.bf16.mxu1 %v3978_v30 }
  0x2d   : > { %3654 = vmatpush3.bf16.msra.mxu0 %v3977_v29 }
  0x2e   : > { %3683 = vmatprep.subr.bf16.mxu0 %v3982_v35 }
  0x2f   : > { %3676 = vmatpush3.bf16.msra.mxu1 %v3981_v34 }
  0x30   : > { %1044 = vmatmul.mubr.bf16.vlgmr.msra.gmra.mxu0 %v3405_v32  ;;  %1238 = vmatprep.subr.bf16.mxu1 %v4004_v18 }
  0x31   : > { %3684 = vmatpush3.bf16.msra.mxu0 %v3985_v39  ;;  %1123 = vmatprep.mubr.bf16.mxu0 %v3410_v50  ;;  %v4161_v39 = vmov 0.0  }
  0x32   : > { %1084 = vmatmul.mubr.bf16.vlgmr.msra.gmra.mxu1 %v3407_v37  ;;  %3685 = vmatprep.subr.bf16.mxu0 %v3986_v40  ;;  %v1131_v37 = vlaneseq }
  0x33   : > { %1239 = vmatpush1.bf16.msra.mxu1 %v4002_v19  ;;  %1262 = vmatprep.mubr.bf16.mxu1 %v4160_v26 }
  0x34   : > { %1240 = vmatprep.subr.bf16.mxu1 %v4007_v20  ;;  %v1178_v38 = vshrl.u32 %v1131_v37, 7 }
  0x35   : > { %3686 = vmatpush3.bf16.msra.mxu0 %v3987_v41  ;;  %v1174_v41 = vld [vmem:[%s4963_s6] sm:$0x3] }
  0x36   : > { %3687 = vmatprep.subr.bf16.mxu0 %v3988_v42  ;;  %v4481_v40 = vsub.s32 0, %v1178_v38  ;;  %v4492_v49 = vsub.s32 1, %v1178_v38 }
  0x37   : > { %1241 = vmatpush1.bf16.msra.mxu1 %v4005_v21 }
  0x38   : > { %1242 = vmatprep.subr.bf16.mxu1 %v4010_v22  ;;  %v1180_v42 = vrot.slane %v1174_v41, %v4481_v40  ;;  %v1184_v50 = vrot.slane %v1174_v41, %v4492_v49 }
  0x39   : > { %3688 = vmatpush3.bf16.msra.mxu0 %v3989_v43 }
  0x3a   : > { %3689 = vmatprep.subr.bf16.mxu0 %v3990_v44 }
  0x3b   : > { %1243 = vmatpush1.bf16.msra.mxu1 %v4008_v23 }
  0x3c   : > { %1244 = vmatprep.subr.bf16.mxu1 %v4013_v24 }
  0x3d   : > { %3690 = vmatpush3.bf16.msra.mxu0 %v3991_v45 }
  0x3e   : > { %3691 = vmatprep.subr.bf16.mxu0 %v3992_v46 }
  0x3f   : > { %1245 = vmatpush1.bf16.msra.mxu1 %v4011_v25 }
  0x40   : > { %3796 = vmatprep.subr.bf16.mxu1 %v4161_v39 }
  0x41   : > { %3692 = vmatpush3.bf16.msra.mxu0 %v3993_v47 }
  0x42   : > { %3693 = vmatprep.subr.bf16.mxu0 %v3994_v48 }
  0x45   : > { %3694 = vmatpush3.bf16.msra.mxu0 %v3995_v51 }
  0x46   : > { %3695 = vmatprep.subr.bf16.mxu0 %v3996_v52 }
  0x49   : > { %3696 = vmatpush3.bf16.msra.mxu0 %v3997_v53 }
  0x4a   : > { %3697 = vmatprep.subr.bf16.mxu0 %v3998_v54 }
  0x4d   : > { %3698 = vmatpush3.bf16.msra.mxu0 %v3999_v55 }
  0x4e   : > { %3820 = vmatprep.subr.bf16.mxu0 %v4161_v39 }
  0x50   : > { %1124 = vmatmul.mubr.bf16.vlgmr.msra.gmra.mxu0 %v3409_v56  ;;  %v1132_v56 = vand.u32 127, %v1131_v37 }
  0x51   : > { %3822 = vmatprep.mubr.msk.bf16.mxu0 %vm4162_vm1, %v4161_v39 }
  0x52   : > { %vm1133_vm4 = vcmp.lt.s32.totalorder %v1132_v56, 5 }
  0xf0   : > { %v3655_v57 = vpop.f32.mrf.mxu0 }
  0xf2   : > { %v3656_v58 = vpop.f32.mrf.mxu0  ;;  %v3677_v59 = vpop.f32.mrf.mxu1 }
  0xf3   : > { %v3657_v1 = vadd.f32 %v3656_v58, %v3655_v57  ;;  %v4164_v57 = vmov -1e+30  }
  0xf4   : > { %v3658_v60 = vpop.f32.mrf.mxu0  ;;  %v3678_v61 = vpop.f32.mrf.mxu1  ;;  %v4505_v58 = vsel %vm1133_vm4, 0.0, %v4164_v57 }
  0xf5   : > { %v1046_v3 = vadd.f32 %v3657_v1, %v701_v2  ;;  %v3679_v4 = vadd.f32 %v3678_v61, %v3677_v59 }
  0xf6   : > { %v3659_v62 = vpop.f32.mrf.mxu0  ;;  %v3680_v63 = vpop.f32.mrf.mxu1 }
  0xf7   : > { %v1086_v7 = vadd.f32 %v3679_v4, %v1046_v3 }
  0xf8   : > { %v3681_v0 = vpop.f32.mrf.mxu1 }
 0x110   : > { %v3699_v5 = vpop.f32.mrf.mxu0 }
 0x112   : > { %v3700_v6 = vpop.f32.mrf.mxu0 }
 0x113   : > { %v3701_v8 = vadd.f32 %v3700_v6, %v3699_v5 }
 0x114   : > { %v3702_v9 = vpop.f32.mrf.mxu0 }
 0x115   : > { %v4441_v10 = vadd.f32 %v3701_v8, %v1086_v7 }
 0x116   : > { %v3703_v11 = vpop.f32.mrf.mxu0 }
 0x117   : > { %v1138_v12 = vsel %vm1137_vm0, %v4441_v10, 0.0 }
 0x118   : > { %1139 = vadd.xlane.f32.xlu0 %v1138_v12 }
 0x1a1   : > { %v1140_v13 = vpop.xlane.xlu0 %1139 }
 0x1a2   : > { %v1142_v14 = vmul.f32 0.015625, %v1140_v13 }
 0x1a4   : > { %v1143_v15 = vsub.f32 %v4441_v10, %v1142_v14 }
 0x1a6   : > { %v1144_v16 = vmul.f32 %v1143_v15, %v1143_v15 }
 0x1a8   : > { %v1145_v17 = vsel %vm1137_vm0, %v1144_v16, 0.0 }
 0x1a9   : > { %1146 = vadd.xlane.f32.xlu0 %v1145_v17 }
 0x232   : > { %v1147_v27 = vpop.xlane.xlu0 %1146 }
 0x233   : > { %v1148_v28 = vmul.f32 0.015625, %v1147_v27 }
 0x235   : > { %v1149_v29 = vadd.f32 1e-06, %v1148_v28 }
 0x237   : > { %4094 = vrsqrt.f32 %v1149_v29 }
 0x244   : > { %v4095_v30 = vpop.eup %4094 }
 0x245   : > { %v1151_v32 = vmul.f32 %v4095_v30, %v1143_v15 }
 0x247   : > { %v1158_v34 = vmul.f32 %v3459_v31, %v1151_v32 }
 0x249   : > { %v1165_v35 = vadd.f32 %v3460_v33, %v1158_v34 }
 0x24b   : > { %v1175_v36 = vpack.c.bf16 %v1165_v35, %v1165_v35 }
 0x24d   : > { %3469 = vmatmul.mubr.msk.bf16.vlgmr.msra.gmra.mxu1 %vm1137_vm0, %v1175_v36 }
 0x24e   : > { %3798 = vmatprep.mubr.msk.bf16.mxu1 %vm4162_vm1, %v4161_v39 }
 0x30d   : > { %v1264_v43 = vpop.f32.mrf.mxu1 }
 0x30e   : > { %v1265_v44 = vadd.f32 %v1264_v43, %v1180_v42 }
 0x30f   : > { %v1266_v45 = vpop.f32.mrf.mxu1 }
 0x310   : > { %v1271_v46 = vpack.c.bf16 %v1265_v44, %v1265_v44  ;;  %v1267_v52 = vadd.f32 %v1266_v45, %v1184_v50 }
 0x311   : > { %v1268_v47 = vpop.f32.mrf.mxu1 }
 0x312   : > { %1273 = vrot.lane.b32.xlu1 %v1271_v46, %s4989_s27  ;;  %v4497_v54 = vpack.c.bf16 %v1267_v52, %v1267_v52 }
 0x313   : > { %v1269_v48 = vpop.f32.mrf.mxu1 }
 0x314   : > { %v1341_v55 = vsel %vm1339_vm3, %v4497_v54, 0 }
 0x384   : > { %v1274_v51 = vpop.permute.xlu1 %1273 }
 0x385   : > { %v1280_v53 = vsel %vm1275_vm2, %v1274_v51, 0 }
 0x386   : > { %3797 = vmatpush3.bf16.xpose.msra.mxu1 %v1280_v53 }
 0x387   : > { %3802 = vmatprep.subr.bf16.mxu1 %v4161_v39 }
 0x38d   : > { %3799 = vmatmul.mubr.msk.bf16.vlgmr.msra.gmra.mxu1 %vm1275_vm2, %v1271_v46 }
 0x38e   : > { %3803 = vmatpush3.bf16.msra.mxu1 %v1341_v55  ;;  %3804 = vmatprep.mubr.msk.bf16.mxu1 %vm4162_vm1, %v4161_v39 }
 0x38f   : > { %3808 = vmatprep.subr.bf16.mxu1 %v4161_v39 }
 0x44d   : > { %v1316_v59 = vpop.f32.mrf.mxu1 }
 0x44e   : > { %v1317_v60 = vadd.f32 %v1316_v59, %v4505_v58 }
 0x44f   : > { %v3800_v61 = vpop.f32.mrf.mxu1 }
 0x450   : > { %v1323_v62 = vsel %vm1322_vm5, %v1317_v60, -inf }
 0x451   : > { %1324 = vmax.xlane.f32.xlu1 %v1323_v62  ;;  %v1319_v63 = vpop.f32.mrf.mxu1 }
 0x453   : > { %v3801_v0 = vpop.f32.mrf.mxu1 }
 0x462   : > { %1494 = vrot.lane.b32.xlu1 %v1271_v46, %s4981_s28 }
 0x4da   : > { %v1325_v1 = vpop.xlane.xlu1 %1324 }
 0x4db   : > { %v1326_v2 = vsub.f32 %v1317_v60, %v1325_v1 }
 0x4dd   : > { %v1327_v3 = vmul.f32 1.442695, %v1326_v2 }
 0x4de   : > { %v1495_v17 = vpop.permute.xlu1 %1494 }
 0x4df   : > { %4096 = vpow2.f32 %v1327_v3 }
 0x4ec   : > { %v4097_v4 = vpop.eup %4096 }
 0x4ed   : > { %v1329_v5 = vsel %vm1322_vm5, %v4097_v4, 0.0 }
 0x4ee   : > { %1330 = vadd.xlane.f32.xlu0 %v1329_v5 }
 0x504   : > { %1385 = vrot.lane.b32.xlu0 %v1271_v46, %s4166_s29 }
 0x508   : > { %1383 = vrot.lane.b32.xlu0 %v1271_v46, %s4985_s20 }
 0x50c   : > { %1496 = vrot.lane.b32.xlu0 %v1271_v46, %s4983_s21 }
 0x510   : > { %1606 = vrot.lane.b32.xlu0 %v1271_v46, %s4987_s23 }
 0x514   : > { %1604 = vrot.lane.b32.xlu0 %v1271_v46, %s4979_s24 }
 0x577   : > { %v1331_v6 = vpop.xlane.xlu0 %1330 }
 0x578   : > { %4098 = vrcp.f32 %v1331_v6 }
 0x57b   : > { %v1386_v7 = vpop.permute.xlu0 %1385 }
 0x57c   : > { %v1391_v16 = vsel %vm1275_vm2, %v1386_v7, 0 }
 0x57f   : > { %v1384_v8 = vpop.permute.xlu0 %1383 }
 0x583   : > { %v1497_v9 = vpop.permute.xlu0 %1496 }
 0x584   : > { %v1502_v11 = vsel %vm1275_vm2, %v1497_v9, 0 }
 0x585   : > { %v4099_v12 = vpop.eup %4098  ;;  %3821 = vmatpush3.bf16.xpose.msra.mxu0 %v1502_v11 }
 0x586   : > { %v1333_v13 = vmul.f32 %v4099_v12, %v4097_v4  ;;  %3832 = vmatprep.subr.bf16.mxu0 %v4161_v39 }
 0x587   : > { %v1607_v15 = vpop.permute.xlu0 %1606 }
 0x588   : > { %v1334_v14 = vpack.c.bf16 %v1333_v13, %v1333_v13  ;;  %v1612_v18 = vsel %vm1275_vm2, %v1607_v15, 0 }
 0x58a   : > { %3805 = vmatmul.mubr.msk.bf16.vlgmr.msra.gmra.mxu1 %vm1322_vm5, %v1334_v14 }
 0x58b   : > { %3809 = vmatpush3.bf16.xpose.msra.mxu1 %v1391_v16  ;;  %3810 = vmatprep.mubr.msk.bf16.mxu1 %vm4162_vm1, %v4161_v39  ;;  %v1605_v19 = vpop.permute.xlu0 %1604 }
 0x58c   : > { %3823 = vmatmul.mubr.msk.bf16.vlgmr.msra.gmra.mxu0 %vm1275_vm2, %v1495_v17  ;;  %3814 = vmatprep.subr.bf16.mxu1 %v4161_v39  ;;  %v4014_v17 = vld [vmem:[%s4964_s7 + $0x18] sm:$0xff]  }
 0x58d   : > { %3833 = vmatpush3.bf16.xpose.msra.mxu0 %v1612_v18  ;;  %3834 = vmatprep.mubr.msk.bf16.mxu0 %vm4162_vm1, %v4161_v39  ;;  %v4015_v18 = vld [vmem:[%s4964_s7 + $0x10] sm:$0xff]  }
 0x58e   : > { %3844 = vmatprep.subr.bf16.mxu0 %v4161_v39 }
 0x592   : > { %3811 = vmatmul.mubr.msk.bf16.vlgmr.msra.gmra.mxu1 %vm1275_vm2, %v1384_v8 }
 0x593   : > { %3816 = vmatprep.mubr.msk.bf16.mxu1 %vm4162_vm1, %v4161_v39 }
 0x594   : > { %3835 = vmatmul.mubr.msk.bf16.vlgmr.msra.gmra.mxu0 %vm1275_vm2, %v1605_v19  ;;  %v4016_v19 = vld [vmem:[%s4964_s7 + $0x8] sm:$0xff]  }
 0x595   : > { %3852 = vmatprep.mubr.msk.bf16.mxu0 %vm4162_vm1, %v4161_v39  ;;  %3845 = vmatpush3.bf16.msra.mxu0 %v4014_v17  ;;  %v4035_v17 = vld [vmem:[%s4970_s13 + $0x28] sm:$0xff]  }
 0x596   : > { %3846 = vmatprep.subr.bf16.mxu0 %v4161_v39 }
 0x599   : > { %3847 = vmatpush3.bf16.msra.mxu0 %v4015_v18  ;;  %v4036_v18 = vld [vmem:[%s4970_s13 + $0x60] sm:$0xff]  }
 0x59a   : > { %3848 = vmatprep.subr.bf16.mxu0 %v4161_v39 }
 0x59d   : > { %3849 = vmatpush3.bf16.msra.mxu0 %v4016_v19  ;;  %v4037_v19 = vld [vmem:[%s4970_s13 + $0x20] sm:$0xff]  }
 0x59e   : > { %3850 = vmatprep.subr.bf16.mxu0 %v4161_v39 }
 0x64a   : > { %v4534_v20 = vpop.f32.mrf.mxu1 }
 0x64c   : > { %v3806_v21 = vpop.f32.mrf.mxu1  ;;  %v1538_v22 = vpop.f32.mrf.mxu0 }
 0x64d   : > { %v1539_v23 = vadd.f32 %v1538_v22, %v4505_v58 }
 0x64e   : > { %v1380_v24 = vpop.f32.mrf.mxu1  ;;  %v3824_v25 = vpop.f32.mrf.mxu0 }
 0x64f   : > { %v1544_v27 = vsel %vm1322_vm5, %v1539_v23, -inf }
 0x650   : > { %1545 = vmax.xlane.f32.xlu1 %v1544_v27  ;;  %v3807_v28 = vpop.f32.mrf.mxu1  ;;  %v1541_v29 = vpop.f32.mrf.mxu0 }
 0x652   : > { %v1427_v30 = vpop.f32.mrf.mxu1  ;;  %v3825_v31 = vpop.f32.mrf.mxu0 }
 0x653   : > { %v1428_v32 = vadd.f32 %v1427_v30, %v4505_v58 }
 0x654   : > { %v3812_v33 = vpop.f32.mrf.mxu1  ;;  %v1648_v34 = vpop.f32.mrf.mxu0 }
 0x655   : > { %v1649_v35 = vadd.f32 %v1648_v34, %v4505_v58  ;;  %v1433_v36 = vsel %vm1322_vm5, %v1428_v32, -inf }
 0x656   : > { %v3836_v37 = vpop.f32.mrf.mxu0  ;;  %1434 = vmax.xlane.f32.xlu0 %v1433_v36  ;;  %v1430_v38 = vpop.f32.mrf.mxu1 }
 0x657   : > { %v1654_v43 = vsel %vm1322_vm5, %v1649_v35, -inf }
 0x658   : > { %v3813_v41 = vpop.f32.mrf.mxu1  ;;  %v1651_v42 = vpop.f32.mrf.mxu0 }
 0x65a   : > { %v3837_v44 = vpop.f32.mrf.mxu0  ;;  %1655 = vmax.xlane.f32.xlu0 %v1654_v43 }
 0x65b   : > { %v3478_v44 = vld [vmem:[%s4965_s8] ss:$0 sm:$0xff] }
 0x661   : > { %1446 = vrot.lane.b32.xlu1 %v4497_v54, %s4985_s20 }
 0x665   : > { %1666 = vrot.lane.b32.xlu1 %v4497_v54, %s4979_s24  ;;  %s3404_s24 = sshll.u32 %s5005_s30, 3 }
 0x6d9   : > { %v1546_v45 = vpop.xlane.xlu1 %1545 }
 0x6da   : > { %v1547_v46 = vsub.f32 %v1539_v23, %v1546_v45  ;;  %v4017_v23 = vld [vmem:[%s4964_s7] sm:$0xff]  }
 0x6db   : > { %3851 = vmatpush3.bf16.msra.mxu0 %v4017_v23  ;;  %v4040_v23 = vld [vmem:[%s4970_s13 + $0x50] sm:$0xff]  }
 0x6dc   : > { %v1548_v47 = vmul.f32 1.442695, %v1547_v46 }
 0x6dd   : > { %v1447_v48 = vpop.permute.xlu1 %1446 }
 0x6de   : > { %4100 = vpow2.f32 %v1548_v47  ;;  %v1452_v50 = vsel %vm1339_vm3, %v1447_v48, 0 }
 0x6df   : > { %3815 = vmatpush3.bf16.msra.mxu1 %v1452_v50  ;;  %v1435_v51 = vpop.xlane.xlu0 %1434 }
 0x6e0   : > { %v1436_v52 = vsub.f32 %v1428_v32, %v1435_v51  ;;  %3826 = vmatprep.subr.bf16.mxu1 %v4161_v39 }
 0x6e1   : > { %v1667_v11 = vpop.permute.xlu1 %1666 }
 0x6e2   : > { %v1437_v53 = vmul.f32 1.442695, %v1436_v52  ;;  %v1672_v14 = vsel %vm1339_vm3, %v1667_v11, 0 }
 0x6e3   : > { %v1656_v55 = vpop.xlane.xlu0 %1655 }
 0x6e4   : > { %4102 = vpow2.f32 %v1437_v53  ;;  %v1657_v56 = vsub.f32 %v1649_v35, %v1656_v55 }
 0x6e6   : > { %v1658_v57 = vmul.f32 1.442695, %v1657_v56 }
 0x6e8   : > { %4104 = vpow2.f32 %v1658_v57 }
 0x6eb   : > { %v4101_v59 = vpop.eup %4100 }
 0x6ec   : > { %v1550_v60 = vsel %vm1322_vm5, %v4101_v59, 0.0 }
 0x6ed   : > { %1551 = vadd.xlane.f32.xlu0 %v1550_v60  ;;  %v4023_v60 = vld [vmem:[%s4968_s11 + $0x24] ss:$8 sps:$4 sm:$0xff]  }
 0x6f1   : > { %v4103_v61 = vpop.eup %4102 }
 0x6f2   : > { %v1439_v62 = vsel %vm1322_vm5, %v4103_v61, 0.0 }
 0x6f3   : > { %1440 = vadd.xlane.f32.xlu0 %v1439_v62  ;;  %v4026_v62 = vld [vmem:[%s4968_s11 + $0x14] ss:$8 sps:$4 sm:$0xff]  }
 0x6f5   : > { %v4105_v63 = vpop.eup %4104 }
 0x6f6   : > { %v1660_v0 = vsel %vm1322_vm5, %v4105_v63, 0.0 }
 0x6f7   : > { %1661 = vadd.xlane.f32.xlu0 %v1660_v0  ;;  %v4029_v0 = vld [vmem:[%s4968_s11 + $0x4] ss:$8 sps:$4 sm:$0xff]  }
 0x70d   : > { %1556 = vrot.lane.b32.xlu0 %v4497_v54, %s4981_s28 }
 0x776   : > { %v1552_v1 = vpop.xlane.xlu0 %1551 }
 0x77c   : > { %v1441_v2 = vpop.xlane.xlu0 %1440 }
 0x77d   : > { %4106 = vrcp.f32 %v1441_v2 }
 0x77e   : > { %4108 = vrcp.f32 %v1552_v1  ;;  %v4027_v1 = vld [vmem:[%s4968_s11] ss:$8 sps:$4 sm:$0xff]  }
 0x780   : > { %v1662_v3 = vpop.xlane.xlu0 %1661 }
 0x781   : > { %4110 = vrcp.f32 %v1662_v3 }
 0x784   : > { %v1557_v6 = vpop.permute.xlu0 %1556 }
 0x785   : > { %v1562_v9 = vsel %vm1339_vm3, %v1557_v6, 0  ;;  %v3484_v6 = vld [vmem:[%s4966_s9] ss:$0 sm:$0xff] }
 0x78a   : > { %v4107_v4 = vpop.eup %4106 }
 0x78b   : > { %v1443_v5 = vmul.f32 %v4107_v4, %v4103_v61  ;;  %v4109_v8 = vpop.eup %4108  ;;  %v4021_v61 = vld [vmem:[%s4968_s11 + $0x20] ss:$8 sps:$4 sm:$0xff]  }
 0x78c   : > { %v1554_v54 = vmul.f32 %v4109_v8, %v4101_v59  ;;  %v4020_v59 = vld [vmem:[%s4968_s11 + $0x34] ss:$8 sps:$4 sm:$0xff]   ;;  %v3485_v8 = vld [vmem:[%s4967_s10] ss:$0 sm:$0xff] }
 0x78d   : > { %v1444_v7 = vpack.c.bf16 %v1443_v5, %v1443_v5 }
 0x78e   : > { %v1555_v12 = vpack.c.bf16 %v1554_v54, %v1554_v54  ;;  %v4111_v13 = vpop.eup %4110 }
 0x78f   : > { %3817 = vmatmul.mubr.msk.bf16.vlgmr.msra.gmra.mxu1 %vm1322_vm5, %v1444_v7  ;;  %v1664_v15 = vmul.f32 %v4111_v13, %v4105_v63  ;;  %v4024_v63 = vld [vmem:[%s4968_s11 + $0x10] ss:$8 sps:$4 sm:$0xff]  }
 0x790   : > { %3827 = vmatpush3.bf16.msra.mxu1 %v1562_v9  ;;  %3828 = vmatprep.mubr.msk.bf16.mxu1 %vm4162_vm1, %v4161_v39  ;;  %v4031_v13 = vld [vmem:[%s4970_s13 + $0x38] sm:$0xff]  }
 0x791   : > { %3838 = vmatprep.subr.bf16.mxu1 %v4161_v39  ;;  %v1665_v16 = vpack.c.bf16 %v1664_v15, %v1664_v15  ;;  %v4033_v15 = vld [vmem:[%s4970_s13 + $0x30] sm:$0xff]  }
 0x797   : > { %3829 = vmatmul.mubr.msk.bf16.vlgmr.msra.gmra.mxu1 %vm1322_vm5, %v1555_v12  ;;  %v4030_v12 = vld [vmem:[%s4970_s13 + $0x78] sm:$0xff]  }
 0x798   : > { %3839 = vmatpush3.bf16.msra.mxu1 %v1672_v14  ;;  %3840 = vmatprep.mubr.msk.bf16.mxu1 %vm4162_vm1, %v4161_v39  ;;  %v4032_v14 = vld [vmem:[%s4970_s13 + $0x70] sm:$0xff]  }
 0x799   : > { %1916 = vmatprep.subr.bf16.mxu1 %v4020_v59  ;;  %3726 = vmatprep.subr.bf16.mxu0 %v4030_v12 }
 0x79f   : > { %3841 = vmatmul.mubr.msk.bf16.vlgmr.msra.gmra.mxu1 %vm1322_vm5, %v1665_v16  ;;  %v4034_v16 = vld [vmem:[%s4970_s13 + $0x68] sm:$0xff]  }
 0x7a0   : > { %1940 = vmatprep.mubr.bf16.mxu1 %v4160_v26 }
 0x84f   : > { %v1488_v21 = vpop.f32.mrf.mxu1 }
 0x850   : > { %1715 = vrot.lane.b32.xlu1 %v1488_v21, %s4987_s23  ;;  %v4038_v21 = vld [vmem:[%s4970_s13 + $0x58] sm:$0xff]   ;;  %s4999_s23 = smov 16  }
 0x851   : > { %v3818_v22 = vpop.f32.mrf.mxu1 }
 0x852   : > { %v4039_v22 = vld [vmem:[%s4970_s13 + $0x18] sm:$0xff]  }
 0x853   : > { %v1491_v24 = vpop.f32.mrf.mxu1 }
 0x854   : > { %v4041_v24 = vld [vmem:[%s4970_s13 + $0x10] sm:$0xff]  }
 0x855   : > { %v3819_v25 = vpop.f32.mrf.mxu1 }
 0x856   : > { %v4042_v25 = vld [vmem:[%s4970_s13 + $0x48] sm:$0xff]  }
 0x857   : > { %v1598_v27 = vpop.f32.mrf.mxu1 }
 0x858   : > { %1719 = vrot.lane.b32.xlu1 %v1598_v27, %s4983_s21  ;;  %v4043_v27 = vld [vmem:[%s4970_s13 + $0x8] sm:$0xff]   ;;  %s4998_s21 = smov 64  }
 0x859   : > { %v3830_v28 = vpop.f32.mrf.mxu1 }
 0x85a   : > { %v4044_v28 = vld [vmem:[%s4970_s13 + $0x40] sm:$0xff]  }
 0x85b   : > { %v1601_v29 = vpop.f32.mrf.mxu1 }
 0x85c   : > { %v4045_v29 = vld [vmem:[%s4970_s13] sm:$0xff]  }
 0x85d   : > { %v3831_v30 = vpop.f32.mrf.mxu1 }
 0x85e   : > { %v1852_v30 = vld [vmem:[%s4969_s12] sm:$0x3] }
 0x85f   : > { %v1708_v31 = vpop.f32.mrf.mxu1 }
 0x860   : > { %1723 = vrot.lane.b32.xlu0 %v1708_v31, %s4166_s29  ;;  %v1858_v31 = vrot.slane %v1852_v30, %v4481_v40 }
 0x861   : > { %v3842_v32 = vpop.f32.mrf.mxu1 }
 0x862   : > { %v1862_v32 = vrot.slane %v1852_v30, %v4492_v49 }
 0x863   : > { %v1711_v33 = vpop.f32.mrf.mxu1 }
 0x865   : > { %v3843_v34 = vpop.f32.mrf.mxu1 }
 0x8c2   : > { %v1716_v35 = vpop.permute.xlu1 %1715 }
 0x8c3   : > { %v1726_v37 = vsel %vm1275_vm2, %v4534_v20, %v1716_v35 }
 0x8ca   : > { %v1720_v36 = vpop.permute.xlu1 %1719 }
 0x8cb   : > { %v1728_v38 = vsel %vm1727_vm6, %v1726_v37, %v1720_v36 }
 0x8d2   : > { %v1724_v41 = vpop.permute.xlu0 %1723 }
 0x8d3   : > { %v1730_v42 = vsel %vm1729_vm7, %v1728_v38, %v1724_v41 }
 0x8d4   : > { %v1740_v43 = vpack.c.bf16 %v1730_v42, %v1730_v42 }
 0x8d6   : > { %3853 = vmatmul.mubr.msk.bf16.vlgmr.msra.gmra.mxu0 %vm1137_vm0, %v1740_v43 }
 0x8d7   : > { %3727 = vmatpush3.bf16.msra.mxu0 %v4031_v13 }
 0x8d8   : > { %3728 = vmatprep.subr.bf16.mxu0 %v4032_v14 }
 0x8db   : > { %3729 = vmatpush3.bf16.msra.mxu0 %v4033_v15 }
 0x8dc   : > { %3730 = vmatprep.subr.bf16.mxu0 %v4034_v16 }
 0x8df   : > { %3731 = vmatpush3.bf16.msra.mxu0 %v4035_v17 }
 0x8e0   : > { %3732 = vmatprep.subr.bf16.mxu0 %v4036_v18 }
 0x8e3   : > { %3733 = vmatpush3.bf16.msra.mxu0 %v4037_v19 }
 0x8e4   : > { %3734 = vmatprep.subr.bf16.mxu0 %v4038_v21 }
 0x8e7   : > { %3735 = vmatpush3.bf16.msra.mxu0 %v4039_v22 }
 0x8e8   : > { %3736 = vmatprep.subr.bf16.mxu0 %v4040_v23 }
 0x8eb   : > { %3737 = vmatpush3.bf16.msra.mxu0 %v4041_v24 }
 0x8ec   : > { %3738 = vmatprep.subr.bf16.mxu0 %v4042_v25 }
 0x8ef   : > { %3739 = vmatpush3.bf16.msra.mxu0 %v4043_v27 }
 0x8f0   : > { %3740 = vmatprep.subr.bf16.mxu0 %v4044_v28 }
 0x8f3   : > { %3741 = vmatpush3.bf16.msra.mxu0 %v4045_v29 }
 0x8f4   : > { %3868 = vmatprep.subr.bf16.mxu0 %v4161_v39 }
 0x996   : > { %v1808_v45 = vpop.f32.mrf.mxu0 }
 0x997   : > { %v1809_v46 = vadd.f32 %v3478_v44, %v1808_v45 }
 0x998   : > { %v3854_v47 = vpop.f32.mrf.mxu0 }
 0x999   : > { %v4591_v48 = vadd.f32 %v1809_v46, %v4441_v10  ;;  %v4018_v10 = vld [vmem:[%s4968_s11 + $0x30] ss:$8 sps:$4 sm:$0xff]  }
 0x99a   : > { %v1811_v50 = vpop.f32.mrf.mxu0  ;;  %1917 = vmatpush1.bf16.msra.mxu1 %v4018_v10 }
 0x99b   : > { %v1817_v20 = vsel %vm1137_vm0, %v4591_v48, 0.0  ;;  %1918 = vmatprep.subr.bf16.mxu1 %v4023_v60 }
 0x99c   : > { %1818 = vadd.xlane.f32.xlu1 %v1817_v20  ;;  %v3855_v51 = vpop.f32.mrf.mxu0 }
 0x99e   : > { %1919 = vmatpush1.bf16.msra.mxu1 %v4021_v61 }
 0x99f   : > { %1920 = vmatprep.subr.bf16.mxu1 %v4026_v62 }
 0x9a2   : > { %1921 = vmatpush1.bf16.msra.mxu1 %v4024_v63 }
 0x9a3   : > { %1922 = vmatprep.subr.bf16.mxu1 %v4029_v0 }
 0x9a6   : > { %1923 = vmatpush1.bf16.msra.mxu1 %v4027_v1 }
 0xa25   : > { %v1819_v52 = vpop.xlane.xlu1 %1818 }
 0xa26   : > { %v1820_v53 = vmul.f32 0.015625, %v1819_v52 }
 0xa28   : > { %v1821_v55 = vsub.f32 %v4591_v48, %v1820_v53 }
 0xa2a   : > { %v1822_v56 = vmul.f32 %v1821_v55, %v1821_v55 }
 0xa2c   : > { %v1823_v57 = vsel %vm1137_vm0, %v1822_v56, 0.0 }
 0xa2d   : > { %1824 = vadd.xlane.f32.xlu0 %v1823_v57 }
 0xab6   : > { %v1825_v2 = vpop.xlane.xlu0 %1824 }
 0xab7   : > { %v1826_v3 = vmul.f32 0.015625, %v1825_v2 }
 0xab9   : > { %v1827_v4 = vadd.f32 1e-06, %v1826_v3 }
 0xabb   : > { %4112 = vrsqrt.f32 %v1827_v4 }
 0xac8   : > { %v4113_v5 = vpop.eup %4112 }
 0xac9   : > { %v1829_v7 = vmul.f32 %v4113_v5, %v1821_v55 }
 0xacb   : > { %v1836_v9 = vmul.f32 %v3484_v6, %v1829_v7 }
 0xacd   : > { %v1843_v54 = vadd.f32 %v3485_v8, %v1836_v9 }
 0xacf   : > { %v1853_v11 = vpack.c.bf16 %v1843_v54, %v1843_v54 }
 0xad1   : > { %3494 = vmatmul.mubr.msk.bf16.vlgmr.msra.gmra.mxu1 %vm1137_vm0, %v1853_v11 }
 0xad2   : > { %2310 = vmatprep.mubr.bf16.mxu1 %v4160_v26 }
 0xb91   : > { %v1942_v33 = vpop.f32.mrf.mxu1 }
 0xb92   : > { %v1943_v34 = vadd.f32 %v1942_v33, %v1858_v31 }
 0xb93   : > { %v1944_v35 = vpop.f32.mrf.mxu1 }
 0xb94   : > { %v1951_v36 = vmul.f32 0.70710677, %v1943_v34  ;;  %v1945_v37 = vadd.f32 %v1944_v35, %v1862_v32  ;;  %v1949_v24 = vmul.f32 0.5, %v1943_v34  ;;  %v3495_v35 = vld [vmem:[%s4971_s14] ss:$0 sm:$0xff] }
 0xb95   : > { %v1946_v38 = vpop.f32.mrf.mxu1 }
 0xb96   : > { %v1953_v41 = vand.u32 2147483647, %v1951_v36  ;;  %v1952_v42 = vmul.f32 0.70710677, %v1945_v37  ;;  %vm1993_vm8 = vcmp.ge.f32.partialorder %v1951_v36, 0.0  ;;  %v1950_v27 = vmul.f32 0.5, %v1945_v37 }
 0xb97   : > { %v1947_v43 = vpop.f32.mrf.mxu1 }
 0xb98   : > { %v1955_v44 = vmul.f32 0.3275911, %v1953_v41  ;;  %v1954_v45 = vand.u32 2147483647, %v1952_v42  ;;  %v1981_v20 = vsub.f32 0.0, %v1953_v41  ;;  %vm1994_vm9 = vcmp.ge.f32.partialorder %v1952_v42, 0.0 }
 0xb9a   : > { %v1957_v46 = vadd.f32 1.0, %v1955_v44  ;;  %v1956_v47 = vmul.f32 0.3275911, %v1954_v45  ;;  %v1982_v51 = vsub.f32 0.0, %v1954_v45  ;;  %v1983_v52 = vmul.f32 %v1981_v20, %v1953_v41  ;;  %v4048_v20 = vld [vmem:[%s4962_s5 + $0x74] ss:$8 sps:$4 sm:$0xff]  }
 0xb9b   : > { %2286 = vmatprep.subr.bf16.mxu1 %v4048_v20 }
 0xb9c   : > { %4114 = vrcp.f32 %v1957_v46  ;;  %v1958_v50 = vadd.f32 1.0, %v1956_v47  ;;  %v1984_v55 = vmul.f32 %v1982_v51, %v1954_v45  ;;  %v1985_v57 = vmul.f32 1.442695, %v1983_v52  ;;  %v4051_v51 = vld [vmem:[%s4962_s5 + $0x64] ss:$8 sps:$4 sm:$0xff]  }
 0xb9d   : > { %v4049_v52 = vld [vmem:[%s4962_s5 + $0x60] ss:$8 sps:$4 sm:$0xff]  }
 0xb9e   : > { %4116 = vrcp.f32 %v1958_v50  ;;  %v1987_v60 = vmul.f32 1.442695, %v1984_v55  ;;  %v4052_v55 = vld [vmem:[%s4962_s5 + $0x50] ss:$8 sps:$4 sm:$0xff]  }
 0xb9f   : > { %4118 = vpow2.f32 %v1985_v57  ;;  %v4055_v57 = vld [vmem:[%s4962_s5 + $0x40] ss:$8 sps:$4 sm:$0xff]  }
 0xba0   : > { %4120 = vpow2.f32 %v1987_v60 }
 0xba9   : > { %v4115_v53 = vpop.eup %4114 }
 0xbaa   : > { %v1963_v56 = vmul.f32 1.0614054, %v4115_v53 }
 0xbab   : > { %v4117_v59 = vpop.eup %4116 }
 0xbac   : > { %v1965_v10 = vadd.f32 -1.4531521, %v1963_v56  ;;  %v1964_v61 = vmul.f32 1.0614054, %v4117_v59  ;;  %v4119_v11 = vpop.eup %4118  ;;  %v4057_v56 = vld [vmem:[%s4962_s5 + $0x44] ss:$8 sps:$4 sm:$0xff]  }
 0xbad   : > { %v4121_v15 = vpop.eup %4120 }
 0xbae   : > { %v1967_v62 = vmul.f32 %v4115_v53, %v1965_v10  ;;  %v1966_v63 = vadd.f32 -1.4531521, %v1964_v61 }
 0xbb0   : > { %v1969_v0 = vadd.f32 1.4214138, %v1967_v62  ;;  %v1968_v1 = vmul.f32 %v4117_v59, %v1966_v63  ;;  %v3514_v62 = vld [vmem:[%s4997_s25 + $0x1] ss:$0 sm:$0xff] }
 0xbb2   : > { %v1971_v2 = vmul.f32 %v4115_v53, %v1969_v0  ;;  %v1970_v3 = vadd.f32 1.4214138, %v1968_v1  ;;  %v3515_v0 = vld [vmem:[%s4961_s4 + $0x1] ss:$0 sm:$0xff] }
 0xbb4   : > { %v1973_v4 = vadd.f32 -0.28449672, %v1971_v2  ;;  %v1972_v5 = vmul.f32 %v4117_v59, %v1970_v3 }
 0xbb6   : > { %v1975_v6 = vmul.f32 %v4115_v53, %v1973_v4  ;;  %v1974_v7 = vadd.f32 -0.28449672, %v1972_v5  ;;  %v3524_v4 = vld [vmem:[%s4963_s6 + $0x2] sm:$0x3] }
 0xbb7   : > { %v2228_v5 = vrot.slane %v3524_v4, %v4481_v40 }
 0xbb8   : > { %v1977_v8 = vadd.f32 0.2548296, %v1975_v6  ;;  %v1976_v9 = vmul.f32 %v4117_v59, %v1974_v7 }
 0xbba   : > { %v1979_v54 = vmul.f32 %v4115_v53, %v1977_v8  ;;  %v1978_v12 = vadd.f32 0.2548296, %v1976_v9  ;;  %v4054_v53 = vld [vmem:[%s4962_s5 + $0x54] ss:$8 sps:$4 sm:$0xff]  }
 0xbbc   : > { %v1989_v13 = vmul.f32 %v4119_v11, %v1979_v54  ;;  %v1980_v14 = vmul.f32 %v4117_v59, %v1978_v12  ;;  %v2232_v12 = vrot.slane %v3524_v4, %v4492_v49 }
 0xbbe   : > { %v1991_v16 = vsub.f32 1.0, %v1989_v13  ;;  %v1990_v17 = vmul.f32 %v4121_v15, %v1980_v14 }
 0xbc0   : > { %v1995_v18 = vsub.f32 0.0, %v1991_v16  ;;  %v1992_v19 = vsub.f32 1.0, %v1990_v17 }
 0xbc2   : > { %v1997_v21 = vsel %vm1993_vm8, %v1991_v16, %v1995_v18  ;;  %v1996_v23 = vsub.f32 0.0, %v1992_v19 }
 0xbc3   : > { %v1999_v22 = vadd.f32 1.0, %v1997_v21 }
 0xbc4   : > { %v1998_v25 = vsel %vm1994_vm9, %v1992_v19, %v1996_v23 }
 0xbc5   : > { %v2000_v28 = vadd.f32 1.0, %v1998_v25  ;;  %v2001_v29 = vmul.f32 %v1999_v22, %v1949_v24 }
 0xbc7   : > { %v2002_v30 = vmul.f32 %v2000_v28, %v1950_v27  ;;  %v2036_v32 = vpack.c.bf16 %v2001_v29, %v2001_v29 }
 0xbc9   : > { %v2037_v31 = vpack.c.bf16 %v2002_v30, %v2002_v30 }
 0xbcb   : > { %2172 = vmatprep.mubr.bf16.mxu0 %v2037_v31 }
 0xbcc   : > { %2173 = vmatmul.mubr.bf16.vlgmr.msra.gmra.mxu0 %v2036_v32 }
 0xbcd   : > { %3870 = vmatprep.mubr.msk.bf16.mxu0 %vm4162_vm1, %v4161_v39 }
 0xc8c   : > { %v3742_v33 = vpop.f32.mrf.mxu0 }
 0xc8e   : > { %v3743_v36 = vpop.f32.mrf.mxu0 }
 0xc8f   : > { %v3744_v38 = vadd.f32 %v3743_v36, %v3742_v33 }
 0xc90   : > { %v3745_v34 = vpop.f32.mrf.mxu0 }
 0xc91   : > { %v2175_v41 = vadd.f32 %v3744_v38, %v3495_v35 }
 0xc92   : > { %v3746_v37 = vpop.f32.mrf.mxu0 }
 0xc93   : > { %v4689_v42 = vadd.f32 %v2175_v41, %v4591_v48  ;;  %v4046_v48 = vld [vmem:[%s4962_s5 + $0x70] ss:$8 sps:$4 sm:$0xff]  }
 0xc94   : > { %2287 = vmatpush1.bf16.msra.mxu1 %v4046_v48 }
 0xc95   : > { %v2185_v43 = vsel %vm1137_vm0, %v4689_v42, 0.0  ;;  %2288 = vmatprep.subr.bf16.mxu1 %v4051_v51 }
 0xc96   : > { %2186 = vadd.xlane.f32.xlu0 %v2185_v43 }
 0xc98   : > { %2289 = vmatpush1.bf16.msra.mxu1 %v4049_v52 }
 0xc99   : > { %2290 = vmatprep.subr.bf16.mxu1 %v4054_v53 }
 0xc9c   : > { %2291 = vmatpush1.bf16.msra.mxu1 %v4052_v55 }
 0xc9d   : > { %2292 = vmatprep.subr.bf16.mxu1 %v4057_v56 }
 0xca0   : > { %2293 = vmatpush1.bf16.msra.mxu1 %v4055_v57 }
 0xca1   : > { %3856 = vmatprep.subr.bf16.mxu1 %v4161_v39 }
 0xd1f   : > { %v2187_v44 = vpop.xlane.xlu0 %2186 }
 0xd20   : > { %v2188_v45 = vmul.f32 0.015625, %v2187_v44 }
 0xd22   : > { %v2189_v46 = vsub.f32 %v4689_v42, %v2188_v45 }
 0xd24   : > { %v2190_v47 = vmul.f32 %v2189_v46, %v2189_v46 }
 0xd26   : > { %v2191_v50 = vsel %vm1137_vm0, %v2190_v47, 0.0 }
 0xd27   : > { %2192 = vadd.xlane.f32.xlu0 %v2191_v50 }
 0xdb0   : > { %v2193_v59 = vpop.xlane.xlu0 %2192 }
 0xdb1   : > { %v2194_v10 = vmul.f32 0.015625, %v2193_v59 }
 0xdb3   : > { %v2195_v60 = vadd.f32 1e-06, %v2194_v10 }
 0xdb5   : > { %4122 = vrsqrt.f32 %v2195_v60 }
 0xdc2   : > { %v4123_v61 = vpop.eup %4122 }
 0xdc3   : > { %v2197_v63 = vmul.f32 %v4123_v61, %v2189_v46 }
 0xdc5   : > { %v2204_v1 = vmul.f32 %v3514_v62, %v2197_v63 }
 0xdc7   : > { %v2211_v2 = vadd.f32 %v3515_v0, %v2204_v1 }
 0xdc9   : > { %v2223_v3 = vpack.c.bf16 %v2211_v2, %v2211_v2 }
 0xdcb   : > { %3533 = vmatmul.mubr.msk.bf16.vlgmr.msra.gmra.mxu1 %vm1137_vm0, %v2223_v3 }
 0xdcc   : > { %3858 = vmatprep.mubr.msk.bf16.mxu1 %vm4162_vm1, %v4161_v39 }
 0xe8b   : > { %v2312_v6 = vpop.f32.mrf.mxu1 }
 0xe8c   : > { %v2313_v7 = vadd.f32 %v2312_v6, %v2228_v5 }
 0xe8d   : > { %v2314_v8 = vpop.f32.mrf.mxu1 }
 0xe8e   : > { %v2319_v9 = vpack.c.bf16 %v2313_v7, %v2313_v7  ;;  %v2315_v15 = vadd.f32 %v2314_v8, %v2232_v12 }
 0xe8f   : > { %v2316_v54 = vpop.f32.mrf.mxu1 }
 0xe90   : > { %2430 = vrot.lane.b32.xlu0 %v2319_v9, %s4166_s29  ;;  %2321 = vrot.lane.b32.xlu1 %v2319_v9, %s4998_s21  ;;  %v4745_v19 = vpack.c.bf16 %v2315_v15, %v2315_v15 }
 0xe91   : > { %v2317_v11 = vpop.f32.mrf.mxu1 }
 0xe92   : > { %v2386_v23 = vsel %vm1339_vm3, %v4745_v19, 0 }
 0xe94   : > { %2651 = vrot.lane.b32.xlu0 %v2319_v9, %s4999_s23  ;;  %2428 = vrot.lane.b32.xlu1 %v2319_v9, %s5000_s26 }
 0xe98   : > { %2541 = vrot.lane.b32.xlu1 %v2319_v9, %s5001_s22 }
 0xe9c   : > { %2539 = vrot.lane.b32.xlu1 %v2319_v9, %s5002_s2 }
 0xea0   : > { %2649 = vrot.lane.b32.xlu1 %v2319_v9, %s5003_s3 }
 0xf02   : > { %v2431_v13 = vpop.permute.xlu0 %2430  ;;  %v2322_v14 = vpop.permute.xlu1 %2321 }
 0xf03   : > { %v2436_v16 = vsel %vm1275_vm2, %v2431_v13, 0  ;;  %v2327_v17 = vsel %vm1275_vm2, %v2322_v14, 0 }
 0xf04   : > { %3857 = vmatpush3.bf16.xpose.msra.mxu1 %v2327_v17  ;;  %3869 = vmatpush3.bf16.xpose.msra.mxu0 %v2436_v16 }
 0xf05   : > { %3862 = vmatprep.subr.bf16.mxu1 %v4161_v39  ;;  %3880 = vmatprep.subr.bf16.mxu0 %v4161_v39 }
 0xf06   : > { %v2429_v18 = vpop.permute.xlu1 %2428  ;;  %v2652_v24 = vpop.permute.xlu0 %2651 }
 0xf07   : > { %v2657_v27 = vsel %vm1275_vm2, %v2652_v24, 0 }
 0xf0a   : > { %v2542_v21 = vpop.permute.xlu1 %2541 }
 0xf0b   : > { %v2547_v22 = vsel %vm1275_vm2, %v2542_v21, 0  ;;  %3859 = vmatmul.mubr.msk.bf16.vlgmr.msra.gmra.mxu1 %vm1275_vm2, %v2319_v9  ;;  %3871 = vmatmul.mubr.msk.bf16.vlgmr.msra.gmra.mxu0 %vm1275_vm2, %v2429_v18 }
 0xf0c   : > { %3863 = vmatpush3.bf16.msra.mxu1 %v2386_v23  ;;  %3881 = vmatpush3.bf16.xpose.msra.mxu0 %v2547_v22 }
 0xf0d   : > { %3882 = vmatprep.mubr.msk.bf16.mxu0 %vm4162_vm1, %v4161_v39  ;;  %3892 = vmatprep.subr.bf16.mxu0 %v4161_v39 }
 0xf0e   : > { %3864 = vmatprep.mubr.msk.bf16.mxu1 %vm4162_vm1, %v4161_v39  ;;  %3874 = vmatprep.subr.bf16.mxu1 %v4161_v39  ;;  %v2540_v25 = vpop.permute.xlu1 %2539 }
 0xf12   : > { %v2650_v28 = vpop.permute.xlu1 %2649 }
 0xf13   : > { %3883 = vmatmul.mubr.msk.bf16.vlgmr.msra.gmra.mxu0 %vm1275_vm2, %v2540_v25 }
 0xf14   : > { %3893 = vmatpush3.bf16.xpose.msra.mxu0 %v2657_v27  ;;  %3894 = vmatprep.mubr.msk.bf16.mxu0 %vm4162_vm1, %v4161_v39 }
 0xf15   : > { %3904 = vmatprep.subr.bf16.mxu0 %v4161_v39 }
 0xf1b   : > { %3895 = vmatmul.mubr.msk.bf16.vlgmr.msra.gmra.mxu0 %vm1275_vm2, %v2650_v28 }
 0xf1c   : > { %3912 = vmatprep.mubr.msk.bf16.mxu0 %vm4162_vm1, %v4161_v39 }
 0xfcb   : > { %v2363_v29 = vpop.f32.mrf.mxu1  ;;  %v2472_v30 = vpop.f32.mrf.mxu0 }
 0xfcc   : > { %v2364_v31 = vadd.f32 %v2363_v29, %v4505_v58  ;;  %v2473_v32 = vadd.f32 %v2472_v30, %v4505_v58 }
 0xfcd   : > { %v3860_v33 = vpop.f32.mrf.mxu1  ;;  %v3872_v35 = vpop.f32.mrf.mxu0 }
 0xfce   : > { %v2369_v36 = vsel %vm1322_vm5, %v2364_v31, -inf  ;;  %v2478_v38 = vsel %vm1322_vm5, %v2473_v32, -inf }
 0xfcf   : > { %2370 = vmax.xlane.f32.xlu0 %v2369_v36  ;;  %v2366_v34 = vpop.f32.mrf.mxu1  ;;  %2479 = vmax.xlane.f32.xlu1 %v2478_v38  ;;  %v2475_v41 = vpop.f32.mrf.mxu0 }
 0xfd1   : > { %v3861_v37 = vpop.f32.mrf.mxu1  ;;  %v3873_v43 = vpop.f32.mrf.mxu0 }
 0xfd2   : > { %v4058_v37 = vld [vmem:[%s4964_s7 + $0x38] sm:$0xff]  }
 0xfd3   : > { %v2583_v44 = vpop.f32.mrf.mxu0  ;;  %3905 = vmatpush3.bf16.msra.mxu0 %v4058_v37  ;;  %v4080_v37 = vld [vmem:[%s4970_s13 + $0xe0] sm:$0xff]  }
 0xfd4   : > { %v2584_v45 = vadd.f32 %v2583_v44, %v4505_v58  ;;  %v4059_v44 = vld [vmem:[%s4964_s7 + $0x30] sm:$0xff]   ;;  %3906 = vmatprep.subr.bf16.mxu0 %v4161_v39 }
 0xfd5   : > { %v3884_v46 = vpop.f32.mrf.mxu0 }
 0xfd6   : > { %v2589_v47 = vsel %vm1322_vm5, %v2584_v45, -inf }
 0xfd7   : > { %2590 = vmax.xlane.f32.xlu0 %v2589_v47  ;;  %v2586_v50 = vpop.f32.mrf.mxu0  ;;  %3907 = vmatpush3.bf16.msra.mxu0 %v4059_v44  ;;  %v4082_v44 = vld [vmem:[%s4970_s13 + $0xd8] sm:$0xff]  }
 0xfd8   : > { %3908 = vmatprep.subr.bf16.mxu0 %v4161_v39 }
 0xfd9   : > { %v3885_v20 = vpop.f32.mrf.mxu0 }
 0xfdb   : > { %v2693_v48 = vpop.f32.mrf.mxu0 }
 0xfdc   : > { %v2694_v51 = vadd.f32 %v2693_v48, %v4505_v58 }
 0xfdd   : > { %v3896_v52 = vpop.f32.mrf.mxu0 }
 0xfde   : > { %v2699_v53 = vsel %vm1322_vm5, %v2694_v51, -inf }
 0xfdf   : > { %2700 = vmax.xlane.f32.xlu0 %v2699_v53  ;;  %v2696_v55 = vpop.f32.mrf.mxu0  ;;  %v4061_v53 = vld [vmem:[%s4964_s7 + $0x20] sm:$0xff]  }
 0xfe1   : > { %v3897_v56 = vpop.f32.mrf.mxu0 }
0x1058   : > { %v2371_v57 = vpop.xlane.xlu0 %2370  ;;  %v2480_v59 = vpop.xlane.xlu1 %2479 }
0x1059   : > { %v2372_v10 = vsub.f32 %v2364_v31, %v2371_v57  ;;  %v2481_v60 = vsub.f32 %v2473_v32, %v2480_v59 }
0x105b   : > { %v2373_v61 = vmul.f32 1.442695, %v2372_v10  ;;  %v2482_v62 = vmul.f32 1.442695, %v2481_v60 }
0x105d   : > { %4124 = vpow2.f32 %v2373_v61 }
0x105e   : > { %4126 = vpow2.f32 %v2482_v62 }
0x1060   : > { %v2591_v63 = vpop.xlane.xlu0 %2590 }
0x1061   : > { %v2592_v0 = vsub.f32 %v2584_v45, %v2591_v63 }
0x1063   : > { %v2593_v1 = vmul.f32 1.442695, %v2592_v0 }
0x1065   : > { %4128 = vpow2.f32 %v2593_v1 }
0x1068   : > { %v2701_v7 = vpop.xlane.xlu0 %2700 }
0x1069   : > { %v2702_v8 = vsub.f32 %v2694_v51, %v2701_v7 }
0x106a   : > { %v4125_v2 = vpop.eup %4124 }
0x106b   : > { %v4127_v58 = vpop.eup %4126  ;;  %v2375_v3 = vsel %vm1322_vm5, %v4125_v2, 0.0  ;;  %v2703_v9 = vmul.f32 1.442695, %v2702_v8 }
0x106c   : > { %2376 = vadd.xlane.f32.xlu0 %v2375_v3  ;;  %v2484_v4 = vsel %vm1322_vm5, %v4127_v58, 0.0 }
0x106d   : > { %2485 = vadd.xlane.f32.xlu1 %v2484_v4  ;;  %4130 = vpow2.f32 %v2703_v9 }
0x1072   : > { %v4129_v5 = vpop.eup %4128 }
0x1073   : > { %v2595_v6 = vsel %vm1322_vm5, %v4129_v5, 0.0 }
0x1074   : > { %2596 = vadd.xlane.f32.xlu0 %v2595_v6 }
0x107a   : > { %v4131_v54 = vpop.eup %4130 }
0x107b   : > { %v2705_v11 = vsel %vm1322_vm5, %v4131_v54, 0.0 }
0x107e   : > { %2601 = vrot.lane.b32.xlu1 %v4745_v19, %s5002_s2 }
0x108a   : > { %2491 = vrot.lane.b32.xlu0 %v4745_v19, %s5000_s26 }
0x10a2   : > { %2706 = vadd.xlane.f32.xlu1 %v2705_v11 }
0x10b3   : > { %2711 = vrot.lane.b32.xlu1 %v4745_v19, %s5003_s3 }
0x10f5   : > { %v2377_v12 = vpop.xlane.xlu0 %2376 }
0x10f6   : > { %4132 = vrcp.f32 %v2377_v12  ;;  %v2486_v13 = vpop.xlane.xlu1 %2485 }
0x10f7   : > { %4134 = vrcp.f32 %v2486_v13 }
0x10fa   : > { %v2602_v23 = vpop.permute.xlu1 %2601 }
0x10fb   : > { %v2607_v27 = vsel %vm1339_vm3, %v2602_v23, 0 }
0x10fd   : > { %v2597_v14 = vpop.xlane.xlu0 %2596 }
0x10fe   : > { %4136 = vrcp.f32 %v2597_v14  ;;  %v4064_v14 = vld [vmem:[%s4968_s11 + $0x74] ss:$8 sps:$4 sm:$0xff]  }
0x1101   : > { %v2492_v17 = vpop.permute.xlu0 %2491 }
0x1102   : > { %v2497_v22 = vsel %vm1339_vm3, %v2492_v17, 0  ;;  %v4070_v17 = vld [vmem:[%s4968_s11 + $0x54] ss:$8 sps:$4 sm:$0xff]  }
0x1103   : > { %v4133_v15 = vpop.eup %4132 }
0x1104   : > { %v2379_v16 = vmul.f32 %v4133_v15, %v4125_v2  ;;  %v4135_v21 = vpop.eup %4134  ;;  %v3551_v2 = vld [vmem:[%s4965_s8 + $0x1] ss:$0 sm:$0xff]  ;;  %v4067_v15 = vld [vmem:[%s4968_s11 + $0x64] ss:$8 sps:$4 sm:$0xff]  }
0x1105   : > { %v2488_v19 = vmul.f32 %v4135_v21, %v4127_v58  ;;  %v4073_v21 = vld [vmem:[%s4968_s11 + $0x44] ss:$8 sps:$4 sm:$0xff]  }
0x1106   : > { %v2380_v18 = vpack.c.bf16 %v2379_v16, %v2379_v16  ;;  %v4065_v16 = vld [vmem:[%s4968_s11 + $0x60] ss:$8 sps:$4 sm:$0xff]  }
0x1107   : > { %v2489_v24 = vpack.c.bf16 %v2488_v19, %v2488_v19 }
0x1108   : > { %3865 = vmatmul.mubr.msk.bf16.vlgmr.msra.gmra.mxu1 %vm1322_vm5, %v2380_v18  ;;  %v4068_v18 = vld [vmem:[%s4968_s11 + $0x50] ss:$8 sps:$4 sm:$0xff]  }
0x1109   : > { %3875 = vmatpush3.bf16.msra.mxu1 %v2497_v22  ;;  %3876 = vmatprep.mubr.msk.bf16.mxu1 %vm4162_vm1, %v4161_v39  ;;  %v4071_v22 = vld [vmem:[%s4968_s11 + $0x40] ss:$8 sps:$4 sm:$0xff]  }
0x110a   : > { %3886 = vmatprep.subr.bf16.mxu1 %v4161_v39 }
0x110b   : > { %v4137_v25 = vpop.eup %4136 }
0x110c   : > { %v2599_v28 = vmul.f32 %v4137_v25, %v4129_v5 }
0x110e   : > { %v2600_v29 = vpack.c.bf16 %v2599_v28, %v2599_v28 }
0x1110   : > { %3877 = vmatmul.mubr.msk.bf16.vlgmr.msra.gmra.mxu1 %vm1322_vm5, %v2489_v24 }
0x1111   : > { %3887 = vmatpush3.bf16.msra.mxu1 %v2607_v27  ;;  %3888 = vmatprep.mubr.msk.bf16.mxu1 %vm4162_vm1, %v4161_v39  ;;  %v3559_v27 = vld [vmem:[%s4966_s9 + $0x1] ss:$0 sm:$0xff] }
0x1112   : > { %3898 = vmatprep.subr.bf16.mxu1 %v4161_v39 }
0x1118   : > { %3889 = vmatmul.mubr.msk.bf16.vlgmr.msra.gmra.mxu1 %vm1322_vm5, %v2600_v29  ;;  %v3560_v29 = vld [vmem:[%s4967_s10 + $0x1] ss:$0 sm:$0xff] }
0x1119   : > { %3900 = vmatprep.mubr.msk.bf16.mxu1 %vm4162_vm1, %v4161_v39 }
0x112b   : > { %v2707_v30 = vpop.xlane.xlu1 %2706 }
0x112c   : > { %4138 = vrcp.f32 %v2707_v30 }
0x112f   : > { %v2712_v31 = vpop.permute.xlu1 %2711 }
0x1130   : > { %v2717_v32 = vsel %vm1339_vm3, %v2712_v31, 0 }
0x1131   : > { %3899 = vmatpush3.bf16.msra.mxu1 %v2717_v32 }
0x1132   : > { %2965 = vmatprep.subr.bf16.mxu1 %v4064_v14 }
0x1139   : > { %v4139_v33 = vpop.eup %4138 }
0x113a   : > { %v2709_v35 = vmul.f32 %v4139_v33, %v4131_v54  ;;  %v4074_v33 = vld [vmem:[%s4970_s13 + $0xf8] sm:$0xff]  }
0x113c   : > { %v2710_v36 = vpack.c.bf16 %v2709_v35, %v2709_v35  ;;  %v4075_v35 = vld [vmem:[%s4970_s13 + $0xb8] sm:$0xff]  }
0x113e   : > { %3901 = vmatmul.mubr.msk.bf16.vlgmr.msra.gmra.mxu1 %vm1322_vm5, %v2710_v36  ;;  %v4076_v36 = vld [vmem:[%s4970_s13 + $0xf0] sm:$0xff]  }
0x113f   : > { %2989 = vmatprep.mubr.bf16.mxu1 %v4160_v26  ;;  %v4060_v26 = vld [vmem:[%s4964_s7 + $0x28] sm:$0xff]  }
0x1140   : > { %3909 = vmatpush3.bf16.msra.mxu0 %v4060_v26  ;;  %v4085_v26 = vld [vmem:[%s4970_s13 + $0x90] sm:$0xff]  }
0x1141   : > { %3910 = vmatprep.subr.bf16.mxu0 %v4161_v39 }
0x1144   : > { %3911 = vmatpush3.bf16.msra.mxu0 %v4061_v53 }
0x1145   : > { %3769 = vmatprep.subr.bf16.mxu0 %v4074_v33 }
0x11c8   : > { %v2422_v38 = vpop.f32.mrf.mxu1 }
0x11ca   : > { %v3866_v34 = vpop.f32.mrf.mxu1 }
0x11cb   : > { %v4078_v34 = vld [vmem:[%s4970_s13 + $0xe8] sm:$0xff]  }
0x11cc   : > { %v2425_v41 = vpop.f32.mrf.mxu1 }
0x11cd   : > { %v4079_v41 = vld [vmem:[%s4970_s13 + $0xa8] sm:$0xff]  }
0x11ce   : > { %v3867_v43 = vpop.f32.mrf.mxu1 }
0x11cf   : > { %v4081_v43 = vld [vmem:[%s4970_s13 + $0xa0] sm:$0xff]  }
0x11d0   : > { %v2533_v45 = vpop.f32.mrf.mxu1 }
0x11d1   : > { %2760 = vrot.lane.b32.xlu1 %v2533_v45, %s4999_s23  ;;  %v4083_v45 = vld [vmem:[%s4970_s13 + $0x98] sm:$0xff]   ;;  %s600_s23 = scalar_lea.vmem %s4976_s19, %s3404_s24 }
0x11d2   : > { %v3878_v46 = vpop.f32.mrf.mxu1 }
0x11d3   : > { %v4084_v46 = vld [vmem:[%s4970_s13 + $0xd0] sm:$0xff]  }
0x11d4   : > { %v2536_v47 = vpop.f32.mrf.mxu1 }
0x11d5   : > { %v4086_v47 = vld [vmem:[%s4970_s13 + $0xc8] sm:$0xff]  }
0x11d6   : > { %v3879_v50 = vpop.f32.mrf.mxu1 }
0x11d7   : > { %v4087_v50 = vld [vmem:[%s4970_s13 + $0x88] sm:$0xff]  }
0x11d8   : > { %v2643_v20 = vpop.f32.mrf.mxu1 }
0x11d9   : > { %2764 = vrot.lane.b32.xlu0 %v2643_v20, %s5001_s22  ;;  %v4088_v20 = vld [vmem:[%s4970_s13 + $0xc0] sm:$0xff]  }
0x11da   : > { %v3890_v48 = vpop.f32.mrf.mxu1 }
0x11db   : > { %v4089_v48 = vld [vmem:[%s4970_s13 + $0x80] sm:$0xff]  }
0x11dc   : > { %v2646_v51 = vpop.f32.mrf.mxu1 }
0x11dd   : > { %v3569_v51 = vld [vmem:[%s4969_s12 + $0x2] sm:$0x3] }
0x11de   : > { %v3891_v52 = vpop.f32.mrf.mxu1  ;;  %v2911_v53 = vrot.slane %v3569_v51, %v4492_v49 }
0x11df   : > { %v2907_v52 = vrot.slane %v3569_v51, %v4481_v40  ;;  %v3612_v51 = vld [vmem:[%s4971_s14 + $0x1] ss:$0 sm:$0xff] }
0x11fe   : > { %v2753_v55 = vpop.f32.mrf.mxu1 }
0x11ff   : > { %2768 = vrot.lane.b32.xlu1 %v2753_v55, %s4166_s29 }
0x1200   : > { %v3902_v56 = vpop.f32.mrf.mxu1 }
0x1202   : > { %v2756_v57 = vpop.f32.mrf.mxu1 }
0x1204   : > { %v3903_v59 = vpop.f32.mrf.mxu1 }
0x1243   : > { %v2761_v10 = vpop.permute.xlu1 %2760 }
0x1244   : > { %v2771_v61 = vsel %vm1275_vm2, %v2422_v38, %v2761_v10  ;;  %v4077_v38 = vld [vmem:[%s4970_s13 + $0xb0] sm:$0xff]  }
0x124b   : > { %v2765_v60 = vpop.permute.xlu0 %2764 }
0x124c   : > { %v2772_v62 = vsel %vm1727_vm6, %v2771_v61, %v2765_v60 }
0x1271   : > { %v2769_v63 = vpop.permute.xlu1 %2768 }
0x1272   : > { %v2773_v0 = vsel %vm1729_vm7, %v2772_v62, %v2769_v63 }
0x1273   : > { %v2785_v1 = vpack.c.bf16 %v2773_v0, %v2773_v0 }
0x1275   : > { %3913 = vmatmul.mubr.msk.bf16.vlgmr.msra.gmra.mxu0 %vm1137_vm0, %v2785_v1 }
0x1276   : > { %3770 = vmatpush3.bf16.msra.mxu0 %v4075_v35 }
0x1277   : > { %3771 = vmatprep.subr.bf16.mxu0 %v4076_v36 }
0x127a   : > { %3772 = vmatpush3.bf16.msra.mxu0 %v4077_v38 }
0x127b   : > { %3773 = vmatprep.subr.bf16.mxu0 %v4078_v34 }
0x127e   : > { %3774 = vmatpush3.bf16.msra.mxu0 %v4079_v41 }
0x127f   : > { %3775 = vmatprep.subr.bf16.mxu0 %v4080_v37 }
0x1282   : > { %3776 = vmatpush3.bf16.msra.mxu0 %v4081_v43 }
0x1283   : > { %3777 = vmatprep.subr.bf16.mxu0 %v4082_v44 }
0x1286   : > { %3778 = vmatpush3.bf16.msra.mxu0 %v4083_v45 }
0x1287   : > { %3779 = vmatprep.subr.bf16.mxu0 %v4084_v46 }
0x128a   : > { %3780 = vmatpush3.bf16.msra.mxu0 %v4085_v26 }
0x128b   : > { %3781 = vmatprep.subr.bf16.mxu0 %v4086_v47 }
0x128e   : > { %3782 = vmatpush3.bf16.msra.mxu0 %v4087_v50 }
0x128f   : > { %3783 = vmatprep.subr.bf16.mxu0 %v4088_v20 }
0x1292   : > { %3784 = vmatpush3.bf16.msra.mxu0 %v4089_v48 }
0x1335   : > { %v2853_v58 = vpop.f32.mrf.mxu0 }
0x1336   : > { %v2854_v3 = vadd.f32 %v3551_v2, %v2853_v58 }
0x1337   : > { %v3914_v4 = vpop.f32.mrf.mxu0 }
0x1338   : > { %v4826_v5 = vadd.f32 %v2854_v3, %v4689_v42  ;;  %v4062_v42 = vld [vmem:[%s4968_s11 + $0x70] ss:$8 sps:$4 sm:$0xff]  }
0x1339   : > { %v2856_v6 = vpop.f32.mrf.mxu0  ;;  %2966 = vmatpush1.bf16.msra.mxu1 %v4062_v42 }
0x133a   : > { %v2864_v7 = vsel %vm1137_vm0, %v4826_v5, 0.0  ;;  %2967 = vmatprep.subr.bf16.mxu1 %v4067_v15 }
0x133b   : > { %2865 = vadd.xlane.f32.xlu0 %v2864_v7  ;;  %v3915_v8 = vpop.f32.mrf.mxu0 }
0x133d   : > { %2968 = vmatpush1.bf16.msra.mxu1 %v4065_v16 }
0x133e   : > { %2969 = vmatprep.subr.bf16.mxu1 %v4070_v17 }
0x1341   : > { %2970 = vmatpush1.bf16.msra.mxu1 %v4068_v18 }
0x1342   : > { %2971 = vmatprep.subr.bf16.mxu1 %v4073_v21 }
0x1345   : > { %2972 = vmatpush1.bf16.msra.mxu1 %v4071_v22 }
0x1346   : > { %3916 = vmatprep.subr.bf16.mxu1 %v4161_v39 }
0x13c4   : > { %v2866_v9 = vpop.xlane.xlu0 %2865 }
0x13c5   : > { %v2867_v54 = vmul.f32 0.015625, %v2866_v9 }
0x13c7   : > { %v2868_v11 = vsub.f32 %v4826_v5, %v2867_v54 }
0x13c9   : > { %v2869_v12 = vmul.f32 %v2868_v11, %v2868_v11 }
0x13cb   : > { %v2870_v13 = vsel %vm1137_vm0, %v2869_v12, 0.0 }
0x13cc   : > { %2871 = vadd.xlane.f32.xlu1 %v2870_v13 }
0x1455   : > { %v2872_v19 = vpop.xlane.xlu1 %2871 }
0x1456   : > { %v2873_v23 = vmul.f32 0.015625, %v2872_v19 }
0x1458   : > { %v2874_v24 = vadd.f32 1e-06, %v2873_v23 }
0x145a   : > { %4140 = vrsqrt.f32 %v2874_v24 }
0x1467   : > { %v4141_v25 = vpop.eup %4140 }
0x1468   : > { %v2876_v28 = vmul.f32 %v4141_v25, %v2868_v11 }
0x146a   : > { %v2883_v30 = vmul.f32 %v3559_v27, %v2876_v28 }
0x146c   : > { %v2890_v31 = vadd.f32 %v3560_v29, %v2883_v30 }
0x146e   : > { %v2902_v32 = vpack.c.bf16 %v2890_v31, %v2890_v31 }
0x1470   : > { %3578 = vmatmul.mubr.msk.bf16.vlgmr.msra.gmra.mxu1 %vm1137_vm0, %v2902_v32 }
0x1471   : > { %3924 = vmatprep.mubr.msk.bf16.mxu1 %vm4162_vm1, %v4161_v39 }
0x1530   : > { %v2991_v55 = vpop.f32.mrf.mxu1 }
0x1531   : > { %v2992_v56 = vadd.f32 %v2991_v55, %v2907_v52 }
0x1532   : > { %v2993_v57 = vpop.f32.mrf.mxu1 }
0x1533   : > { %v3000_v59 = vmul.f32 0.70710677, %v2992_v56  ;;  %v2994_v10 = vadd.f32 %v2993_v57, %v2911_v53  ;;  %v2998_v43 = vmul.f32 0.5, %v2992_v56 }
0x1534   : > { %v2995_v60 = vpop.f32.mrf.mxu1 }
0x1535   : > { %v3002_v61 = vand.u32 2147483647, %v3000_v59  ;;  %v3001_v62 = vmul.f32 0.70710677, %v2994_v10  ;;  %vm3042_vm10 = vcmp.ge.f32.partialorder %v3000_v59, 0.0  ;;  %v2999_v45 = vmul.f32 0.5, %v2994_v10 }
0x1536   : > { %v2996_v63 = vpop.f32.mrf.mxu1 }
0x1537   : > { %v3004_v0 = vmul.f32 0.3275911, %v3002_v61  ;;  %v3003_v1 = vand.u32 2147483647, %v3001_v62  ;;  %v3030_v4 = vsub.f32 0.0, %v3002_v61  ;;  %vm3043_vm11 = vcmp.ge.f32.partialorder %v3001_v62, 0.0 }
0x1539   : > { %v3006_v2 = vadd.f32 1.0, %v3004_v0  ;;  %v3005_v58 = vmul.f32 0.3275911, %v3003_v1  ;;  %v3031_v40 = vsub.f32 0.0, %v3003_v1  ;;  %v3032_v6 = vmul.f32 %v3030_v4, %v3002_v61 }
0x153b   : > { %4142 = vrcp.f32 %v3006_v2  ;;  %v3007_v3 = vadd.f32 1.0, %v3005_v58  ;;  %v3033_v7 = vmul.f32 %v3031_v40, %v3003_v1  ;;  %v3034_v9 = vmul.f32 1.442695, %v3032_v6  ;;  %v4090_v1 = vld [vmem:[%s4974_s17 + $0x18] sm:$0xff]   ;;  %v4092_v2 = vld [vmem:[%s4974_s17 + $0x8] sm:$0xff]   ;;  %v4093_v58 = vld [vmem:[%s4974_s17] sm:$0xff]  }
0x153c   : > { %3917 = vmatpush3.bf16.msra.mxu1 %v4090_v1 }
0x153d   : > { %4144 = vrcp.f32 %v3007_v3  ;;  %v3036_v12 = vmul.f32 1.442695, %v3033_v7  ;;  %3918 = vmatprep.subr.bf16.mxu1 %v4161_v39 }
0x153e   : > { %4146 = vpow2.f32 %v3034_v9 }
0x153f   : > { %4148 = vpow2.f32 %v3036_v12 }
0x1548   : > { %v4143_v49 = vpop.eup %4142 }
0x1549   : > { %v3012_v8 = vmul.f32 1.0614054, %v4143_v49 }
0x154a   : > { %v4145_v54 = vpop.eup %4144 }
0x154b   : > { %v3014_v11 = vadd.f32 -1.4531521, %v3012_v8  ;;  %v3013_v13 = vmul.f32 1.0614054, %v4145_v54  ;;  %v4147_v28 = vpop.eup %4146  ;;  %v3630_v8 = vld [vmem:[%s4973_s16] ss:$0 sm:$0xff] }
0x154c   : > { %v4149_v32 = vpop.eup %4148 }
0x154d   : > { %v3016_v14 = vmul.f32 %v4143_v49, %v3014_v11  ;;  %v3015_v42 = vadd.f32 -1.4531521, %v3013_v13 }
0x154f   : > { %v3018_v15 = vadd.f32 1.4214138, %v3016_v14  ;;  %v3017_v16 = vmul.f32 %v4145_v54, %v3015_v42 }
0x1551   : > { %v3020_v17 = vmul.f32 %v4143_v49, %v3018_v15  ;;  %v3019_v18 = vadd.f32 1.4214138, %v3017_v16 }
0x1553   : > { %v3022_v21 = vadd.f32 -0.28449672, %v3020_v17  ;;  %v3021_v22 = vmul.f32 %v4145_v54, %v3019_v18 }
0x1555   : > { %v3024_v19 = vmul.f32 %v4143_v49, %v3022_v21  ;;  %v3023_v23 = vadd.f32 -0.28449672, %v3021_v22 }
0x1557   : > { %v3026_v24 = vadd.f32 0.2548296, %v3024_v19  ;;  %v3025_v25 = vmul.f32 %v4145_v54, %v3023_v23 }
0x1559   : > { %v3028_v27 = vmul.f32 %v4143_v49, %v3026_v24  ;;  %v3027_v29 = vadd.f32 0.2548296, %v3025_v25  ;;  %v3629_v49 = vld [vmem:[%s4972_s15] ss:$0 sm:$0xff] }
0x155b   : > { %v3038_v30 = vmul.f32 %v4147_v28, %v3028_v27  ;;  %v3029_v31 = vmul.f32 %v4145_v54, %v3027_v29 }
0x155d   : > { %v3040_v33 = vsub.f32 1.0, %v3038_v30  ;;  %v3039_v35 = vmul.f32 %v4149_v32, %v3029_v31 }
0x155f   : > { %v3044_v36 = vsub.f32 0.0, %v3040_v33  ;;  %v3041_v38 = vsub.f32 1.0, %v3039_v35 }
0x1561   : > { %v3046_v34 = vsel %vm3042_vm10, %v3040_v33, %v3044_v36  ;;  %v3045_v37 = vsub.f32 0.0, %v3041_v38 }
0x1562   : > { %v3048_v41 = vadd.f32 1.0, %v3046_v34 }
0x1563   : > { %v3047_v44 = vsel %vm3043_vm11, %v3041_v38, %v3045_v37 }
0x1564   : > { %v3049_v46 = vadd.f32 1.0, %v3047_v44  ;;  %v3050_v26 = vmul.f32 %v3048_v41, %v2998_v43 }
0x1566   : > { %v3051_v47 = vmul.f32 %v3049_v46, %v2999_v45  ;;  %v3087_v20 = vpack.c.bf16 %v3050_v26, %v3050_v26 }
0x1568   : > { %v3088_v50 = vpack.c.bf16 %v3051_v47, %v3051_v47 }
0x156a   : > { %3223 = vmatprep.mubr.bf16.mxu0 %v3088_v50 }
0x156b   : > { %3224 = vmatmul.mubr.bf16.vlgmr.msra.gmra.mxu0 %v3087_v20 }
0x162b   : > { %v3785_v48 = vpop.f32.mrf.mxu0 }
0x162d   : > { %v3786_v52 = vpop.f32.mrf.mxu0 }
0x162e   : > { %v3787_v53 = vadd.f32 %v3786_v52, %v3785_v48 }
0x162f   : > { %v3788_v55 = vpop.f32.mrf.mxu0 }
0x1630   : > { %v3226_v57 = vadd.f32 %v3787_v53, %v3612_v51 }
0x1631   : > { %v3789_v59 = vpop.f32.mrf.mxu0 }
0x1632   : > { %v3231_v56 = vadd.f32 %v3226_v57, %v4826_v5  ;;  %v4091_v5 = vld [vmem:[%s4974_s17 + $0x10] sm:$0xff]  }
0x1633   : > { %3919 = vmatpush3.bf16.msra.mxu1 %v4091_v5 }
0x1634   : > { %v3234_v10 = vsel %vm1137_vm0, %v3231_v56, 0.0  ;;  %3920 = vmatprep.subr.bf16.mxu1 %v4161_v39 }
0x1635   : > { %3235 = vadd.xlane.f32.xlu0 %v3234_v10 }
0x1637   : > { %3921 = vmatpush3.bf16.msra.mxu1 %v4092_v2 }
0x1638   : > { %3922 = vmatprep.subr.bf16.mxu1 %v4161_v39  ;;  %v3631_v39 = vld [vmem:[%s4975_s18] ss:$0 sm:$0xff] }
0x163b   : > { %3923 = vmatpush3.bf16.msra.mxu1 %v4093_v58 }
0x16be   : > { %v3236_v60 = vpop.xlane.xlu0 %3235 }
0x16bf   : > { %v3237_v61 = vmul.f32 0.015625, %v3236_v60 }
0x16c1   : > { %v3238_v62 = vsub.f32 %v3231_v56, %v3237_v61 }
0x16c3   : > { %v3239_v63 = vmul.f32 %v3238_v62, %v3238_v62 }
0x16c5   : > { %v3240_v0 = vsel %vm1137_vm0, %v3239_v63, 0.0 }
0x16c6   : > { %3241 = vadd.xlane.f32.xlu0 %v3240_v0 }
0x174f   : > { %v3242_v3 = vpop.xlane.xlu0 %3241 }
0x1750   : > { %v3243_v4 = vmul.f32 0.015625, %v3242_v3 }
0x1752   : > { %v3244_v40 = vadd.f32 1e-06, %v3243_v4 }
0x1754   : > { %4150 = vrsqrt.f32 %v3244_v40 }
0x1761   : > { %v4151_v6 = vpop.eup %4150 }
0x1762   : > { %v3246_v7 = vmul.f32 %v4151_v6, %v3238_v62 }
0x1764   : > { %v3253_v9 = vmul.f32 %v3629_v49, %v3246_v7 }
0x1766   : > { %v3260_v54 = vadd.f32 %v3630_v8, %v3253_v9 }
0x1768   : > { %v3270_v11 = vpack.c.bf16 %v3260_v54, %v3260_v54 }
0x176a   : > { %3925 = vmatmul.mubr.msk.bf16.vlgmr.msra.gmra.mxu1 %vm1137_vm0, %v3270_v11 }
0x182a   : > { %v3338_v12 = vpop.f32.mrf.mxu1 }
0x182b   : > { %v3339_v13 = vadd.f32 %v3631_v39, %v3338_v12 }
0x182c   : > { %v3926_v14 = vpop.f32.mrf.mxu1 }
0x182d   : > { %3344 = vst [vmem:[%s600_s23] sm:$0xff] %v3339_v13 }
0x182e   : > { %v3341_v42 = vpop.f32.mrf.mxu1 }
0x1830   : > { %v3927_v15 = vpop.f32.mrf.mxu1 }
0x1831 PF: > { %s29_s0 = sadd.s32 1, %s4158_s0  }
0x1832   : > { %p26_p4 = scmp.ge.s32.totalorder %s29_s0, 4  }
0x1834   :  { %28 = sbr.rel (!%p26_p4) target bundleno = 5 (0x5), region = 138 }

</bundles_post_ra>
